<compile_context>
chip_gen: v7x
topology: tpu7x:2x2x1
jax: 0.10.0
libtpu: 0.0.40
codegen_flags: <defaults>
</compile_context>

<pallas_src>
import jax
import jax.numpy as jnp
from jax.experimental import pallas as pl
from jax.experimental.pallas import tpu as pltpu

EPS = 1e-5


# ---------- pass 1: conv1 (3x3) + 1x1 shortcut (both pre-BN) + their stats ----------
def pass1_kernel(x_ref, w1_ref, ws_ref, y1_ref, ys_ref, stats_ref):
    n = pl.program_id(0)
    _, Hp, Wp, Cp = x_ref.shape
    H, W = Hp - 2, Wp - 2
    R = H * W

    @pl.when(n == 0)
    def _():
        stats_ref[...] = jnp.zeros_like(stats_ref)

    xp = x_ref[...].reshape(Hp, Wp, Cp)                     # bf16, one padded image
    acc1 = jnp.zeros((R, Cp), jnp.float32)
    centre = None
    t = 0
    for dy in range(3):
        for dx in range(3):
            tap = xp[dy:dy + H, dx:dx + W, :].reshape(R, Cp)        # bf16 (R, Cp)
            if t == 4:                                              # centre tap == x
                centre = tap
            acc1 = acc1 + jnp.dot(tap, w1_ref[pl.ds(t * Cp, Cp), :],
                                  preferred_element_type=jnp.float32)
            t += 1
    accs = jnp.dot(centre, ws_ref[...], preferred_element_type=jnp.float32)

    y1_ref[...] = acc1.reshape(1, H, W, Cp)
    ys_ref[...] = accs.reshape(1, H, W, Cp)

    # rows: [sum1, sumsq1, sum_s, sumsq_s] — resident accumulator across the grid
    stats_ref[...] += jnp.concatenate(
        [jnp.sum(acc1, axis=0, keepdims=True),
         jnp.sum(acc1 * acc1, axis=0, keepdims=True),
         jnp.sum(accs, axis=0, keepdims=True),
         jnp.sum(accs * accs, axis=0, keepdims=True)], axis=0)


# ---------- pass 2: bn1 + relu -> conv2 (3x3, pre-BN) + bn2 stats ----------
def pass2_kernel(y1_ref, s1_ref, b1_ref, w2_ref, y2_ref, stats_ref, pad_ref):
    n = pl.program_id(0)
    _, H, W, Cp = y1_ref.shape
    R = H * W

    @pl.when(n == 0)
    def _():
        # scratch persists across grid steps: zero once; only the interior is
        # rewritten each step, so the 1-pixel zero border stays valid thereafter.
        pad_ref[...] = jnp.zeros_like(pad_ref)
        stats_ref[...] = jnp.zeros_like(stats_ref)

    scale = s1_ref[...].reshape(1, 1, 1, Cp)
    bias = b1_ref[...].reshape(1, 1, 1, Cp)
    out1 = jnp.maximum(y1_ref[...] * scale + bias, 0.0)             # bn1 + relu (f32)
    pad_ref[1:H + 1, 1:W + 1, :] = out1.reshape(H, W, Cp).astype(jnp.bfloat16)

    xp = pad_ref[...]                                               # (H+2, W+2, Cp) bf16
    acc = jnp.zeros((R, Cp), jnp.float32)
    t = 0
    for dy in range(3):
        for dx in range(3):
            tap = xp[dy:dy + H, dx:dx + W, :].reshape(R, Cp)
            acc = acc + jnp.dot(tap, w2_ref[pl.ds(t * Cp, Cp), :],
                                preferred_element_type=jnp.float32)
            t += 1

    y2_ref[...] = acc.reshape(1, H, W, Cp)
    stats_ref[...] += jnp.concatenate(
        [jnp.sum(acc, axis=0, keepdims=True),
         jnp.sum(acc * acc, axis=0, keepdims=True)], axis=0)


# ---------- pass 3: bn2 + bn_shortcut + residual add + relu (fully parallel) ----------
def pass3_kernel(y2_ref, ys_ref, s2_ref, b2_ref, ss_ref, bs_ref, out_ref):
    Cp = out_ref.shape[-1]
    o2 = y2_ref[...] * s2_ref[...].reshape(1, 1, 1, Cp) + b2_ref[...].reshape(1, 1, 1, Cp)
    os = ys_ref[...] * ss_ref[...].reshape(1, 1, 1, Cp) + bs_ref[...].reshape(1, 1, 1, Cp)
    out_ref[...] = jnp.maximum(o2 + os, 0.0)


def basic_block_forward(x_nchw, params):
    # TODO(synk): keep NHWC end-to-end at real shapes; these transposes only adapt
    #             the PyTorch NCHW spec at the boundary.
    x = jnp.transpose(x_nchw, (0, 2, 3, 1)).astype(jnp.float32)     # NCHW -> NHWC
    N, H, W, Cin = x.shape
    Cout = params["w1"].shape[-1]
    Cp = ((max(Cin, Cout) + 127) // 128) * 128                      # lane-dense channels

    # bf16 ingress: +1 spatial halo per image, channel pad to Cp, cast once.
    x_pad = jnp.pad(x, ((0, 0), (1, 1), (1, 1), (0, Cp - Cin))).astype(jnp.bfloat16)

    # conv weights flattened tap-major to (9*Cp, Cp); shortcut (Cp, Cp); all bf16.
    w1_flat = jnp.pad(params["w1"], ((0, 0), (0, 0), (0, Cp - Cin), (0, Cp - Cout))
                      ).reshape(9 * Cp, Cp).astype(jnp.bfloat16)
    w2_flat = jnp.pad(params["w2"], ((0, 0), (0, 0), (0, Cp - Cout), (0, Cp - Cout))
                      ).reshape(9 * Cp, Cp).astype(jnp.bfloat16)
    ws_pad = jnp.pad(params["ws"], ((0, Cp - Cin), (0, Cp - Cout))).astype(jnp.bfloat16)

    def pad_vec(v):
        return jnp.pad(v, (0, Cp - Cout)).astype(jnp.float32)

    g1, b1 = pad_vec(params["g1"]), pad_vec(params["b1"])
    g2, b2 = pad_vec(params["g2"]), pad_vec(params["b2"])
    gs, bs = pad_vec(params["gs"]), pad_vec(params["bs"])

    R = N * H * W
    vmem_limit = 48 * 1024 * 1024        # sized with v7x's 64 MiB physical VMEM in mind

    img_blk = lambda n: (n, 0, 0, 0)     # per-image activation block
    resident = lambda n: (0, 0)          # weights / stats stay resident across the grid

    # ---- pass 1 ----
    y1, ys, st1 = pl.pallas_call(
        pass1_kernel,
        grid=(N,),
        out_shape=(jax.ShapeDtypeStruct((N, H, W, Cp), jnp.float32),
                   jax.ShapeDtypeStruct((N, H, W, Cp), jnp.float32),
                   jax.ShapeDtypeStruct((4, Cp), jnp.float32)),
        in_specs=[pl.BlockSpec((1, H + 2, W + 2, Cp), img_blk),
                  pl.BlockSpec((9 * Cp, Cp), resident),
                  pl.BlockSpec((Cp, Cp), resident)],
        out_specs=(pl.BlockSpec((1, H, W, Cp), img_blk),
                   pl.BlockSpec((1, H, W, Cp), img_blk),
                   pl.BlockSpec((4, Cp), resident)),
        compiler_params=pltpu.CompilerParams(
            dimension_semantics=("arbitrary",),      # stats accumulator on this axis
            vmem_limit_bytes=vmem_limit),
    )(x_pad, w1_flat, ws_pad)

    def bn_coeffs(s, q, gamma, beta):
        mean = s / R
        var = jnp.maximum(q / R - mean * mean, 0.0)
        scale = gamma * jax.lax.rsqrt(var + EPS)
        return scale.reshape(1, Cp), (beta - mean * scale).reshape(1, Cp)

    s1c, b1c = bn_coeffs(st1[0], st1[1], g1, b1)
    ssc, bsc = bn_coeffs(st1[2], st1[3], gs, bs)

    # ---- pass 2 ----
    y2, st2 = pl.pallas_call(
        pass2_kernel,
        grid=(N,),
        out_shape=(jax.ShapeDtypeStruct((N, H, W, Cp), jnp.float32),
                   jax.ShapeDtypeStruct((2, Cp), jnp.float32)),
        in_specs=[pl.BlockSpec((1, H, W, Cp), img_blk),
                  pl.BlockSpec((1, Cp), resident),
                  pl.BlockSpec((1, Cp), resident),
                  pl.BlockSpec((9 * Cp, Cp), resident)],
        out_specs=(pl.BlockSpec((1, H, W, Cp), img_blk),
                   pl.BlockSpec((2, Cp), resident)),
        scratch_shapes=[pltpu.VMEM((H + 2, W + 2, Cp), jnp.bfloat16)],
        compiler_params=pltpu.CompilerParams(
            dimension_semantics=("arbitrary",),
            vmem_limit_bytes=vmem_limit),
    )(y1, s1c, b1c, w2_flat)

    s2c, b2c = bn_coeffs(st2[0], st2[1], g2, b2)

    # ---- pass 3 ----
    out = pl.pallas_call(
        pass3_kernel,
        grid=(N,),
        out_shape=jax.ShapeDtypeStruct((N, H, W, Cp), jnp.float32),
        in_specs=[pl.BlockSpec((1, H, W, Cp), img_blk),
                  pl.BlockSpec((1, H, W, Cp), img_blk),
                  pl.BlockSpec((1, Cp), resident),
                  pl.BlockSpec((1, Cp), resident),
                  pl.BlockSpec((1, Cp), resident),
                  pl.BlockSpec((1, Cp), resident)],
        out_specs=pl.BlockSpec((1, H, W, Cp), img_blk),
        compiler_params=pltpu.CompilerParams(
            dimension_semantics=("parallel",),       # no accumulator -> megacore on v7x
            vmem_limit_bytes=vmem_limit),
    )(y2, ys, s2c, b2c, ssc, bsc)

    out = out[:, :, :, :Cout]
    return jnp.transpose(out, (0, 3, 1, 2))                         # NHWC -> NCHW


def basic_block_reference(x_nchw, params, matmul_dtype=jnp.float32):
    """Pure-JAX reference with identical (training-mode BN) semantics.

    matmul_dtype=bf16 mirrors the kernel's mixed precision (bf16 MXU inputs,
    f32 accumulation, f32 BN/ReLU); matmul_dtype=f32 is the full-f32 module.
    """
    x = jnp.transpose(x_nchw, (0, 2, 3, 1)).astype(jnp.float32)

    def conv3x3(y, w):
        return jax.lax.conv_general_dilated(
            y.astype(matmul_dtype), w.astype(matmul_dtype), (1, 1), "SAME",
            dimension_numbers=("NHWC", "HWIO", "NHWC"),
            preferred_element_type=jnp.float32)

    def conv1x1(y, w):
        return jax.lax.dot_general(
            y.astype(matmul_dtype), w.astype(matmul_dtype),
            (((3,), (0,)), ((), ())),
            preferred_element_type=jnp.float32)

    def bn(y, g, b):
        mean = jnp.mean(y, axis=(0, 1, 2), keepdims=True)
        var = jnp.mean((y - mean) ** 2, axis=(0, 1, 2), keepdims=True)
        return (y - mean) * jax.lax.rsqrt(var + EPS) * g + b

    o = jax.nn.relu(bn(conv3x3(x, params["w1"]), params["g1"], params["b1"]))
    o = bn(conv3x3(o, params["w2"]), params["g2"], params["b2"])
    s = bn(conv1x1(x, params["ws"]), params["gs"], params["bs"])
    o = jax.nn.relu(o + s)
    return jnp.transpose(o, (0, 3, 1, 2))


def init_params(key, in_planes, planes):
    ks = jax.random.split(key, 9)
    return {
        "w1": 0.1 * jax.random.normal(ks[0], (3, 3, in_planes, planes), jnp.float32),
        "w2": 0.1 * jax.random.normal(ks[1], (3, 3, planes, planes), jnp.float32),
        "ws": 0.1 * jax.random.normal(ks[2], (in_planes, planes), jnp.float32),
        "g1": 1.0 + 0.1 * jax.random.normal(ks[3], (planes,), jnp.float32),
        "b1": 0.1 * jax.random.normal(ks[4], (planes,), jnp.float32),
        "g2": 1.0 + 0.1 * jax.random.normal(ks[5], (planes,), jnp.float32),
        "b2": 0.1 * jax.random.normal(ks[6], (planes,), jnp.float32),
        "gs": 1.0 + 0.1 * jax.random.normal(ks[7], (planes,), jnp.float32),
        "bs": 0.1 * jax.random.normal(ks[8], (planes,), jnp.float32),
    }


if __name__ == "__main__":
    key = jax.random.PRNGKey(0)
    k_x, k_p = jax.random.split(key)

    N, C_in, H, W = 2, 4, 16, 16       # x: NCHW like PyTorch
    planes = 8                         # in_planes != planes -> projection shortcut
    x = jax.random.normal(k_x, (N, C_in, H, W), jnp.float32)
    params = init_params(k_p, C_in, planes)

    out = jax.block_until_ready(basic_block_forward(x, params))
    assert out.shape == (N, planes, H, W)
    assert bool(jnp.all(jnp.isfinite(out)))

    # Tight check vs a reference evaluated with the same bf16-MXU / f32-accum
    # mixed precision as the kernel (verifies the kernel logic exactly).
    ref_mixed = jax.block_until_ready(
        basic_block_reference(x, params, matmul_dtype=jnp.bfloat16))
    assert bool(jnp.allclose(out, ref_mixed, rtol=2e-3, atol=2e-3)), (
        float(jnp.max(jnp.abs(out - ref_mixed))))

    # Sanity check vs the full-f32 module semantics; tolerance covers the bf16
    # rounding of the MXU inputs.
    ref_f32 = jax.block_until_ready(
        basic_block_reference(x, params, matmul_dtype=jnp.float32))
    assert bool(jnp.allclose(out, ref_f32, rtol=5e-2, atol=5e-2)), (
        float(jnp.max(jnp.abs(out - ref_f32))))

    print("KERNEL_OK")
</pallas_src>

<mosaic_0001>
module attributes {stable_mosaic.version = 11 : i64} {
  func.func @pass1_kernel(%arg0: i32, %arg1: memref<1x18x18x128xbf16, #tpu.memory_space<vmem>>, %arg2: memref<1152x128xbf16, #tpu.memory_space<vmem>>, %arg3: memref<128x128xbf16, #tpu.memory_space<vmem>>, %arg4: memref<1x16x16x128xf32, #tpu.memory_space<vmem>>, %arg5: memref<1x16x16x128xf32, #tpu.memory_space<vmem>>, %arg6: memref<4x128xf32, #tpu.memory_space<vmem>>) attributes {dimension_semantics = [#tpu.dimension_semantics<arbitrary>], iteration_bounds = array<i64: 2>, scalar_prefetch = 0 : i64, scratch_operands = 0 : i64, tpu.core_type = #tpu.core_type<tc>, window_params = [{transform_indices = @transform_0, window_bounds = array<i64: 1, 18, 18, 128>}, {pipeline_mode = #tpu.pipeline_mode<synchronous>, transform_indices = @transform_1, window_bounds = array<i64: 1152, 128>}, {pipeline_mode = #tpu.pipeline_mode<synchronous>, transform_indices = @transform_2, window_bounds = array<i64: 128, 128>}, {transform_indices = @transform_3, window_bounds = array<i64: 1, 16, 16, 128>}, {transform_indices = @transform_4, window_bounds = array<i64: 1, 16, 16, 128>}, {pipeline_mode = #tpu.pipeline_mode<synchronous>, transform_indices = @transform_5, window_bounds = array<i64: 4, 128>}]} {
    %c0_i32 = arith.constant 0 : i32
    %0 = arith.cmpi eq, %arg0, %c0_i32 : i32
    %1 = arith.extui %0 : i1 to i32
    %c0_i32_0 = arith.constant 0 : i32
    %2 = arith.cmpi ne, %1, %c0_i32_0 : i32
    scf.if %2 {
      %cst_42 = arith.constant 0.000000e+00 : f32
      %71 = vector.broadcast %cst_42 : f32 to vector<4x128xf32>
      %c0_43 = arith.constant 0 : index
      %c0_44 = arith.constant 0 : index
      %72 = vector.load %arg6[%c0_43, %c0_44] : memref<4x128xf32, #tpu.memory_space<vmem>>, vector<4x128xf32>
      tpu.vector_store %arg6[%c0_43, %c0_44], %71 {strides = array<i32>} : memref<4x128xf32, #tpu.memory_space<vmem>>, vector<4x128xf32>,
    } else {
    }
    %c0 = arith.constant 0 : index
    %c0_1 = arith.constant 0 : index
    %c0_2 = arith.constant 0 : index
    %c0_3 = arith.constant 0 : index
    %3 = vector.load %arg1[%c0, %c0_1, %c0_2, %c0_3] : memref<1x18x18x128xbf16, #tpu.memory_space<vmem>>, vector<1x18x18x128xbf16>
    %4 = vector.shape_cast %3 : vector<1x18x18x128xbf16> to vector<18x18x128xbf16>
    %cst = arith.constant 0.000000e+00 : f32
    %5 = vector.broadcast %cst : f32 to vector<256x128xf32>
    %6 = vector.extract_strided_slice %4 {offsets = [0, 0, 0], sizes = [16, 16, 128], strides = [1, 1, 1]} : vector<18x18x128xbf16> to vector<16x16x128xbf16>
    %7 = vector.shape_cast %6 : vector<16x16x128xbf16> to vector<256x128xbf16>
    %c0_4 = arith.constant 0 : index
    %c0_5 = arith.constant 0 : index
    %8 = vector.load %arg2[%c0_4, %c0_5] : memref<1152x128xbf16, #tpu.memory_space<vmem>>, vector<128x128xbf16>
    %cst_6 = arith.constant dense<0.000000e+00> : vector<256x128xf32>
    %9 = tpu.matmul %7, %8, %cst_6 {dimension_numbers = #tpu.dot_dimension_numbers<[1], [0], [0], [1], [0, 0, 1, 1], [], []>} : vector<256x128xbf16>, vector<128x128xbf16>, vector<256x128xf32> -> vector<256x128xf32>
    %10 = arith.addf %5, %9 : vector<256x128xf32>
    %11 = vector.extract_strided_slice %4 {offsets = [0, 1, 0], sizes = [16, 16, 128], strides = [1, 1, 1]} : vector<18x18x128xbf16> to vector<16x16x128xbf16>
    %12 = vector.shape_cast %11 : vector<16x16x128xbf16> to vector<256x128xbf16>
    %c128 = arith.constant 128 : index
    %c0_7 = arith.constant 0 : index
    %13 = vector.load %arg2[%c128, %c0_7] : memref<1152x128xbf16, #tpu.memory_space<vmem>>, vector<128x128xbf16>
    %cst_8 = arith.constant dense<0.000000e+00> : vector<256x128xf32>
    %14 = tpu.matmul %12, %13, %cst_8 {dimension_numbers = #tpu.dot_dimension_numbers<[1], [0], [0], [1], [0, 0, 1, 1], [], []>} : vector<256x128xbf16>, vector<128x128xbf16>, vector<256x128xf32> -> vector<256x128xf32>
    %15 = arith.addf %10, %14 : vector<256x128xf32>
    %16 = vector.extract_strided_slice %4 {offsets = [0, 2, 0], sizes = [16, 16, 128], strides = [1, 1, 1]} : vector<18x18x128xbf16> to vector<16x16x128xbf16>
    %17 = vector.shape_cast %16 : vector<16x16x128xbf16> to vector<256x128xbf16>
    %c256 = arith.constant 256 : index
    %c0_9 = arith.constant 0 : index
    %18 = vector.load %arg2[%c256, %c0_9] : memref<1152x128xbf16, #tpu.memory_space<vmem>>, vector<128x128xbf16>
    %cst_10 = arith.constant dense<0.000000e+00> : vector<256x128xf32>
    %19 = tpu.matmul %17, %18, %cst_10 {dimension_numbers = #tpu.dot_dimension_numbers<[1], [0], [0], [1], [0, 0, 1, 1], [], []>} : vector<256x128xbf16>, vector<128x128xbf16>, vector<256x128xf32> -> vector<256x128xf32>
    %20 = arith.addf %15, %19 : vector<256x128xf32>
    %21 = vector.extract_strided_slice %4 {offsets = [1, 0, 0], sizes = [16, 16, 128], strides = [1, 1, 1]} : vector<18x18x128xbf16> to vector<16x16x128xbf16>
    %22 = vector.shape_cast %21 : vector<16x16x128xbf16> to vector<256x128xbf16>
    %c384 = arith.constant 384 : index
    %c0_11 = arith.constant 0 : index
    %23 = vector.load %arg2[%c384, %c0_11] : memref<1152x128xbf16, #tpu.memory_space<vmem>>, vector<128x128xbf16>
    %cst_12 = arith.constant dense<0.000000e+00> : vector<256x128xf32>
    %24 = tpu.matmul %22, %23, %cst_12 {dimension_numbers = #tpu.dot_dimension_numbers<[1], [0], [0], [1], [0, 0, 1, 1], [], []>} : vector<256x128xbf16>, vector<128x128xbf16>, vector<256x128xf32> -> vector<256x128xf32>
    %25 = arith.addf %20, %24 : vector<256x128xf32>
    %26 = vector.extract_strided_slice %4 {offsets = [1, 1, 0], sizes = [16, 16, 128], strides = [1, 1, 1]} : vector<18x18x128xbf16> to vector<16x16x128xbf16>
    %27 = vector.shape_cast %26 : vector<16x16x128xbf16> to vector<256x128xbf16>
    %c512 = arith.constant 512 : index
    %c0_13 = arith.constant 0 : index
    %28 = vector.load %arg2[%c512, %c0_13] : memref<1152x128xbf16, #tpu.memory_space<vmem>>, vector<128x128xbf16>
    %cst_14 = arith.constant dense<0.000000e+00> : vector<256x128xf32>
    %29 = tpu.matmul %27, %28, %cst_14 {dimension_numbers = #tpu.dot_dimension_numbers<[1], [0], [0], [1], [0, 0, 1, 1], [], []>} : vector<256x128xbf16>, vector<128x128xbf16>, vector<256x128xf32> -> vector<256x128xf32>
    %30 = arith.addf %25, %29 : vector<256x128xf32>
    %31 = vector.extract_strided_slice %4 {offsets = [1, 2, 0], sizes = [16, 16, 128], strides = [1, 1, 1]} : vector<18x18x128xbf16> to vector<16x16x128xbf16>
    %32 = vector.shape_cast %31 : vector<16x16x128xbf16> to vector<256x128xbf16>
    %c640 = arith.constant 640 : index
    %c0_15 = arith.constant 0 : index
    %33 = vector.load %arg2[%c640, %c0_15] : memref<1152x128xbf16, #tpu.memory_space<vmem>>, vector<128x128xbf16>
    %cst_16 = arith.constant dense<0.000000e+00> : vector<256x128xf32>
    %34 = tpu.matmul %32, %33, %cst_16 {dimension_numbers = #tpu.dot_dimension_numbers<[1], [0], [0], [1], [0, 0, 1, 1], [], []>} : vector<256x128xbf16>, vector<128x128xbf16>, vector<256x128xf32> -> vector<256x128xf32>
    %35 = arith.addf %30, %34 : vector<256x128xf32>
    %36 = vector.extract_strided_slice %4 {offsets = [2, 0, 0], sizes = [16, 16, 128], strides = [1, 1, 1]} : vector<18x18x128xbf16> to vector<16x16x128xbf16>
    %37 = vector.shape_cast %36 : vector<16x16x128xbf16> to vector<256x128xbf16>
    %c768 = arith.constant 768 : index
    %c0_17 = arith.constant 0 : index
    %38 = vector.load %arg2[%c768, %c0_17] : memref<1152x128xbf16, #tpu.memory_space<vmem>>, vector<128x128xbf16>
    %cst_18 = arith.constant dense<0.000000e+00> : vector<256x128xf32>
    %39 = tpu.matmul %37, %38, %cst_18 {dimension_numbers = #tpu.dot_dimension_numbers<[1], [0], [0], [1], [0, 0, 1, 1], [], []>} : vector<256x128xbf16>, vector<128x128xbf16>, vector<256x128xf32> -> vector<256x128xf32>
    %40 = arith.addf %35, %39 : vector<256x128xf32>
    %41 = vector.extract_strided_slice %4 {offsets = [2, 1, 0], sizes = [16, 16, 128], strides = [1, 1, 1]} : vector<18x18x128xbf16> to vector<16x16x128xbf16>
    %42 = vector.shape_cast %41 : vector<16x16x128xbf16> to vector<256x128xbf16>
    %c896 = arith.constant 896 : index
    %c0_19 = arith.constant 0 : index
    %43 = vector.load %arg2[%c896, %c0_19] : memref<1152x128xbf16, #tpu.memory_space<vmem>>, vector<128x128xbf16>
    %cst_20 = arith.constant dense<0.000000e+00> : vector<256x128xf32>
    %44 = tpu.matmul %42, %43, %cst_20 {dimension_numbers = #tpu.dot_dimension_numbers<[1], [0], [0], [1], [0, 0, 1, 1], [], []>} : vector<256x128xbf16>, vector<128x128xbf16>, vector<256x128xf32> -> vector<256x128xf32>
    %45 = arith.addf %40, %44 : vector<256x128xf32>
    %46 = vector.extract_strided_slice %4 {offsets = [2, 2, 0], sizes = [16, 16, 128], strides = [1, 1, 1]} : vector<18x18x128xbf16> to vector<16x16x128xbf16>
    %47 = vector.shape_cast %46 : vector<16x16x128xbf16> to vector<256x128xbf16>
    %c1024 = arith.constant 1024 : index
    %c0_21 = arith.constant 0 : index
    %48 = vector.load %arg2[%c1024, %c0_21] : memref<1152x128xbf16, #tpu.memory_space<vmem>>, vector<128x128xbf16>
    %cst_22 = arith.constant dense<0.000000e+00> : vector<256x128xf32>
    %49 = tpu.matmul %47, %48, %cst_22 {dimension_numbers = #tpu.dot_dimension_numbers<[1], [0], [0], [1], [0, 0, 1, 1], [], []>} : vector<256x128xbf16>, vector<128x128xbf16>, vector<256x128xf32> -> vector<256x128xf32>
    %50 = arith.addf %45, %49 : vector<256x128xf32>
    %c0_23 = arith.constant 0 : index
    %c0_24 = arith.constant 0 : index
    %51 = vector.load %arg3[%c0_23, %c0_24] : memref<128x128xbf16, #tpu.memory_space<vmem>>, vector<128x128xbf16>
    %cst_25 = arith.constant dense<0.000000e+00> : vector<256x128xf32>
    %52 = tpu.matmul %27, %51, %cst_25 {dimension_numbers = #tpu.dot_dimension_numbers<[1], [0], [0], [1], [0, 0, 1, 1], [], []>} : vector<256x128xbf16>, vector<128x128xbf16>, vector<256x128xf32> -> vector<256x128xf32>
    %53 = vector.shape_cast %50 : vector<256x128xf32> to vector<1x16x16x128xf32>
    %c0_26 = arith.constant 0 : index
    %c0_27 = arith.constant 0 : index
    %c0_28 = arith.constant 0 : index
    %c0_29 = arith.constant 0 : index
    %54 = vector.load %arg4[%c0_26, %c0_27, %c0_28, %c0_29] : memref<1x16x16x128xf32, #tpu.memory_space<vmem>>, vector<1x16x16x128xf32>
    tpu.vector_store %arg4[%c0_26, %c0_27, %c0_28, %c0_29], %53 {strides = array<i32>} : memref<1x16x16x128xf32, #tpu.memory_space<vmem>>, vector<1x16x16x128xf32>,
    %55 = vector.shape_cast %52 : vector<256x128xf32> to vector<1x16x16x128xf32>
    %c0_30 = arith.constant 0 : index
    %c0_31 = arith.constant 0 : index
    %c0_32 = arith.constant 0 : index
    %c0_33 = arith.constant 0 : index
    %56 = vector.load %arg5[%c0_30, %c0_31, %c0_32, %c0_33] : memref<1x16x16x128xf32, #tpu.memory_space<vmem>>, vector<1x16x16x128xf32>
    tpu.vector_store %arg5[%c0_30, %c0_31, %c0_32, %c0_33], %55 {strides = array<i32>} : memref<1x16x16x128xf32, #tpu.memory_space<vmem>>, vector<1x16x16x128xf32>,
    %c0_34 = arith.constant 0 : index
    %c0_35 = arith.constant 0 : index
    %57 = vector.load %arg6[%c0_34, %c0_35] : memref<4x128xf32, #tpu.memory_space<vmem>>, vector<4x128xf32>
    %cst_36 = arith.constant dense<0.000000e+00> : vector<128xf32>
    %58 = vector.multi_reduction <add>, %50, %cst_36 [0] : vector<256x128xf32> to vector<128xf32>
    %59 = vector.shape_cast %58 : vector<128xf32> to vector<1x128xf32>
    %60 = arith.mulf %50, %50 : vector<256x128xf32>
    %cst_37 = arith.constant dense<0.000000e+00> : vector<128xf32>
    %61 = vector.multi_reduction <add>, %60, %cst_37 [0] : vector<256x128xf32> to vector<128xf32>
    %62 = vector.shape_cast %61 : vector<128xf32> to vector<1x128xf32>
    %cst_38 = arith.constant dense<0.000000e+00> : vector<128xf32>
    %63 = vector.multi_reduction <add>, %52, %cst_38 [0] : vector<256x128xf32> to vector<128xf32>
    %64 = vector.shape_cast %63 : vector<128xf32> to vector<1x128xf32>
    %65 = arith.mulf %52, %52 : vector<256x128xf32>
    %cst_39 = arith.constant dense<0.000000e+00> : vector<128xf32>
    %66 = vector.multi_reduction <add>, %65, %cst_39 [0] : vector<256x128xf32> to vector<128xf32>
    %67 = vector.shape_cast %66 : vector<128xf32> to vector<1x128xf32>
    %68 = tpu.concatenate %59, %62, %64, %67 in 0 : vector<1x128xf32>, vector<1x128xf32>, vector<1x128xf32>, vector<1x128xf32> -> vector<4x128xf32>
    %69 = arith.addf %57, %68 : vector<4x128xf32>
    %c0_40 = arith.constant 0 : index
    %c0_41 = arith.constant 0 : index
    %70 = vector.load %arg6[%c0_40, %c0_41] : memref<4x128xf32, #tpu.memory_space<vmem>>, vector<4x128xf32>
    tpu.vector_store %arg6[%c0_40, %c0_41], %69 {strides = array<i32>} : memref<4x128xf32, #tpu.memory_space<vmem>>, vector<4x128xf32>,
    return
  }
  func.func @transform_0(%arg0: i32) -> (i32, i32, i32, i32) {
    %c0_i32 = arith.constant 0 : i32
    %c0_i32_0 = arith.constant 0 : i32
    %c0_i32_1 = arith.constant 0 : i32
    %c0_i32_2 = arith.constant 0 : i32
    return %arg0, %c0_i32, %c0_i32_0, %c0_i32_1 : i32, i32, i32, i32
  }
  func.func @transform_1(%arg0: i32) -> (i32, i32) {
    %c0_i32 = arith.constant 0 : i32
    %c0_i32_0 = arith.constant 0 : i32
    %c0_i32_1 = arith.constant 0 : i32
    return %c0_i32, %c0_i32_0 : i32, i32
  }
  func.func @transform_2(%arg0: i32) -> (i32, i32) {
    %c0_i32 = arith.constant 0 : i32
    %c0_i32_0 = arith.constant 0 : i32
    %c0_i32_1 = arith.constant 0 : i32
    return %c0_i32, %c0_i32_0 : i32, i32
  }
  func.func @transform_3(%arg0: i32) -> (i32, i32, i32, i32) {
    %c0_i32 = arith.constant 0 : i32
    %c0_i32_0 = arith.constant 0 : i32
    %c0_i32_1 = arith.constant 0 : i32
    %c0_i32_2 = arith.constant 0 : i32
    return %arg0, %c0_i32, %c0_i32_0, %c0_i32_1 : i32, i32, i32, i32
  }
  func.func @transform_4(%arg0: i32) -> (i32, i32, i32, i32) {
    %c0_i32 = arith.constant 0 : i32
    %c0_i32_0 = arith.constant 0 : i32
    %c0_i32_1 = arith.constant 0 : i32
    %c0_i32_2 = arith.constant 0 : i32
    return %arg0, %c0_i32, %c0_i32_0, %c0_i32_1 : i32, i32, i32, i32
  }
  func.func @transform_5(%arg0: i32) -> (i32, i32) {
    %c0_i32 = arith.constant 0 : i32
    %c0_i32_0 = arith.constant 0 : i32
    %c0_i32_1 = arith.constant 0 : i32
    return %c0_i32, %c0_i32_0 : i32, i32
  }
}

</mosaic_0001>

<bundles_post_ra>
// kernel: tpu_custom_call.1
= control target key start
LH: loop header
LB: loop body
LE: loop exit
PB: predicated region body
PF: predicated region fallthrough
CT: control target
= control target key end

     0   :  { %11 = vsyncpa [#allocation3], 0  ;;  %s6849_s0 = inlined_call_operand.vmem [shape: bf16[2,18,18,128], index: 0, kind: input, shape index: {}]   ;;  %s6850_s1 = inlined_call_operand.vmem [shape: bf16[1152,128], index: 1, kind: input, shape index: {}]   ;;  %s6851_s2 = inlined_call_operand.vmem [shape: bf16[128,128], index: 2, kind: input, shape index: {}]   ;;  %s6852_s3 = inlined_call_operand.hbm [shape: f32[2,16,16,128], index: 3, kind: output, shape index: {0}]   ;;  %s6853_s4 = inlined_call_operand.hbm [shape: f32[2,16,16,128], index: 4, kind: output, shape index: {1}]   ;;  %s6854_s5 = inlined_call_operand.hbm [shape: f32[4,128], index: 5, kind: output, shape index: {2}]  }
   0x1   :  { %13 = vsyncpa [#allocation3 + $0x1], 0 }
   0x2   :  { %14 = vsyncpa [#allocation5], 0 }
   0x3   :  { %16 = vsyncpa [#allocation5 + $0x1], 0  ;;  %s5500_s18 = smov 0   ;;  %s5502_s19 = smov 0  }
   0x4   :  { %s5504_s20 = smov 0   ;;  %s5506_s21 = smov 0  }
   0x5 LB: > { %s5521_s22 = sadd.s32 4294967295, %s5462_s21   ;;  %s4034_s23 = sadd.s32 4294967294, %s5462_s21   ;;  %s5462_s21 = sphi %s5506_s21, %s6957_s21   ;;  %s5458_s20 = sphi %s5504_s20, %s6956_s20   ;;  %s5454_s19 = sphi %s5502_s19, %s6955_s19   ;;  %s5450_s18 = sphi %s5500_s18, %s6954_s18  }
   0x6   : > { %s5525_s24 = sadd.s32 1, %s5462_s21   ;;  %s97_s25 = sadd.s32 1, %s5458_s20 }
   0x7   : > { %s94_s26 = ssub.s32 %s5462_s21, %s5525_s24  ;;  %p107_p0 = scmp.ne.s32.totalorder %s5458_s20, %s5454_s19 }
   0x8   : > { %p95_p1 = scmp.eq.s32.totalorder %s94_s26, 0  ;;  %p108_p2 = scmp.eq.s32.totalorder %s5521_s22, 1 }
   0x9   : > { %p113_p3 = scmp.ne.s32.totalorder %s5454_s19, %s5450_s18  ;;  %p114_p4 = scmp.eq.s32.totalorder %s4034_s23, 1 }
   0xa   : > { %s5538_s27 = scalar_select %p95_p1, %s5458_s20, %s97_s25  }
   0xb   : > { %p5542_p5 = por %p108_p2, %p107_p0  ;;  %p5546_p6 = por %p114_p4, %p113_p3 }
   0xc   : > { %p4037_p7 = scmp.ge.s32.totalorder %s5462_s21, 1  ;;  %p193_p8 = scmp.lt.s32.totalorder %s5462_s21, 3 }
   0xe   : > { %p194_p9 = pnand %p4037_p7, %p193_p8 }
  0x10   : > { %197 = sbr.rel (%p194_p9) target bundleno = 671 (0x29f), region = 32 }
  0x17   : > { %s214_s30 = sand.u32 1, %s5454_s19   ;;  %p226_p10 = scmp.lt.s32.totalorder %s5521_s22, 1 }
  0x18   : > { %s4038_s6 = sshll.u32 %s214_s30, 8  ;;  %p4041_p11 = scmp.ne.s32.totalorder %s5521_s22, 0 }
  0x19   : > { %s227_s7 = scalar_select %p226_p10, %s5521_s22, 1 }
  0x1a   : > { %s5562_s12 = scalar_lea.vmem [#allocation2], %s4038_s6  ;;  %s5564_s13 = scalar_lea.vmem [#allocation4], %s4038_s6  ;;  %v5464_v0 = vmov (!%p4041_p11), 0.0  }
  0x1b   : > { %s5182_s8 = smul.u32 216, %s227_s7  ;;  %236 = vst [vmem:[#allocation6] sm:$0xf] (!%p4041_p11), %v5464_v0 }
  0x1c   : > { %235 = sbr.rel (%p4041_p11) target bundleno = 35 (0x23), region = 36 }
  0x1d   : > { %s5560_s11 = scalar_lea.vmem %s6849_s0, %s5182_s8 }
  0x23 PF: > { %v5237_v1 = vld [vmem:[%s6850_s1 + $0x40] sm:$0xff]   ;;  %v5239_v3 = vld [vmem:[%s6850_s1 + $0x48] sm:$0xff]   ;;  %v5241_v5 = vld [vmem:[%s6850_s1 + $0x50] sm:$0xff]   ;;  %vm307_vm0 = vsmask.f32 3328  ;;  %vm1304_vm3 = vcmask 1042432  }
  0x24   : > { %v5238_v2 = vld [vmem:[%s6850_s1 + $0x100] sm:$0xff]   ;;  %4446 = vmatprep.subr.bf16.mxu1 %v5237_v1  ;;  %v5240_v4 = vld [vmem:[%s6850_s1 + $0x108] sm:$0xff]   ;;  %v5242_v6 = vld [vmem:[%s6850_s1 + $0x110] sm:$0xff]   ;;  %vm308_vm1 = vsmask.f32 7440  ;;  %vm1305_vm4 = vcmask 1046532  }
  0x25   : > { %4638 = vmatprep.subr.bf16.mxu0 %v5238_v2  ;;  %4447 = vmatpush3.bf16.msra.mxu1 %v5237_v1  ;;  %v5243_v7 = vld [vmem:[%s6850_s1 + $0x58] sm:$0xff]   ;;  %v5245_v9 = vld [vmem:[%s6850_s1 + $0x60] sm:$0xff]   ;;  %v5247_v11 = vld [vmem:[%s6850_s1 + $0x68] sm:$0xff]   ;;  %s4204_s6 = sshll.u32 %s5521_s22, 12  ;;  %s3919_s7 = sshll.u32 %s5564_s13, 4  ;;  %s6716_s7 = int_to_ptr.vmem [resolvable:$true] %s3919_s7 }
  0x26   : > { %4639 = vmatpush3.bf16.msra.mxu0 %v5238_v2  ;;  %4448 = vmatprep.subr.bf16.mxu1 %v5239_v3  ;;  %v5244_v8 = vld [vmem:[%s6850_s1 + $0x118] sm:$0xff]   ;;  %v5246_v10 = vld [vmem:[%s6850_s1 + $0x120] sm:$0xff]   ;;  %v5248_v12 = vld [vmem:[%s6850_s1 + $0x128] sm:$0xff]   ;;  %s6714_s10 = scalar_lea.hbm %s6853_s4, %s4204_s6  ;;  %s5338_s15 = scalar_lea.vmem %s6716_s7, 4096 }
  0x27   : > { %4640 = vmatprep.subr.bf16.mxu0 %v5240_v4  ;;  %v5604_v13 = vld [vmem:[%s5560_s11] sm:$0xf]  ;;  %v5607_v14 = vld [vmem:[%s5560_s11 + $0x4] sm:$0xf]  ;;  %v239_v15 = vld [vmem:[%s5560_s11 + $0x8] sm:$0x1]  ;;  %p5339_p12 = scmp.ne.s32.totalorder %s6716_s7, %s5338_s15 }
  0x28   : > { %v311_v16 = vshrl.u32 %v5604_v13, 16  ;;  %v314_v17 = vshll.u32 %v5604_v13, 16  ;;  %v5249_v18 = vld [vmem:[%s6850_s1 + $0x70] sm:$0xff]   ;;  %v320_v19 = vshll.u32 %v5607_v14, 16  ;;  %v324_v20 = vshrl.u32 %v5607_v14, 16  ;;  %v5251_v39 = vld [vmem:[%s6850_s1 + $0x78] sm:$0xff]   ;;  %vm5646_vm2 = vmor %vm307_vm0, %vm308_vm1 }
  0x29   : > { %4449 = vmatpush3.bf16.msra.mxu1 %v5239_v3  ;;  %v330_v21 = vshll.u32 %v239_v15, 16  ;;  %v5618_v22 = vld [vmem:[%s5560_s11 + $0xc] sm:$0xf]  ;;  %v5621_v25 = vld [vmem:[%s5560_s11 + $0x10] sm:$0xf]  ;;  %v5252_v54 = vld [vmem:[%s6850_s1 + $0x138] sm:$0xff]   ;;  %p5340_p13 = pnand %p5339_p12, %p5542_p5 }
  0x2a   : > { %4641 = vmatpush3.bf16.msra.mxu0 %v5240_v4  ;;  %4450 = vmatprep.subr.bf16.mxu1 %v5241_v5  ;;  %v313_v23 = vrot.slane %v311_v16, 4  ;;  %v316_v24 = vrot.slane %v314_v17, 5  ;;  %v5624_v26 = vld [vmem:[%s5560_s11 + $0x14] sm:$0x1]  ;;  %v322_v28 = vrot.slane %v320_v19, 5  ;;  %v326_v29 = vrot.slane %v324_v20, 4  ;;  %vm6037_vm5 = vmor %vm1304_vm3, %vm1305_vm4 }
  0x2b   : > { %4642 = vmatprep.subr.bf16.mxu0 %v5242_v6  ;;  %v332_v30 = vrot.slane %v330_v21, 5  ;;  %v335_v31 = vshrl.u32 %v5618_v22, 16  ;;  %v5630_v32 = vld [vmem:[%s5560_s11 + $0x18] sm:$0xf]  ;;  %v5250_v33 = vld [vmem:[%s6850_s1 + $0x130] sm:$0xff]   ;;  %v338_v35 = vshll.u32 %v5618_v22, 16  ;;  %p5341_p0 = pneg %p5340_p13 }
  0x2c   : > { %v317_v34 = vor.u32 %v316_v24, %v313_v23  ;;  %v344_v36 = vshll.u32 %v5621_v25, 16  ;;  %v348_v37 = vshrl.u32 %v5621_v25, 16  ;;  %v5639_v38 = vld [vmem:[%s5560_s11 + $0x1c] sm:$0xf]  ;;  %v327_v41 = vor.u32 %v326_v29, %v322_v28  ;;  %v5652_v44 = vld [vmem:[%s5560_s11 + $0x20] sm:$0x1] }
  0x2d   : > { %4451 = vmatpush3.bf16.msra.mxu1 %v5241_v5  ;;  %v337_v42 = vrot.slane %v335_v31, 4  ;;  %v354_v43 = vshll.u32 %v5624_v26, 16  ;;  %v359_v45 = vshrl.u32 %v5630_v32, 16  ;;  %v340_v47 = vrot.slane %v338_v35, 5  ;;  %v5667_v63 = vld [vmem:[%s5560_s11 + $0x24] sm:$0xf] }
  0x2e   : > { %4643 = vmatpush3.bf16.msra.mxu0 %v5242_v6  ;;  %4452 = vmatprep.subr.bf16.mxu1 %v5243_v7  ;;  %v318_v46 = vrot.slane %v317_v34, 4  ;;  %v346_v48 = vrot.slane %v344_v36, 5  ;;  %v350_v49 = vrot.slane %v348_v37, 4  ;;  %v328_v50 = vrot.slane %v327_v41, 4  ;;  %v5670_v4 = vld [vmem:[%s5560_s11 + $0x28] sm:$0xf] }
  0x2f   : > { %4644 = vmatprep.subr.bf16.mxu0 %v5244_v8  ;;  %v356_v51 = vrot.slane %v354_v43, 5  ;;  %v361_v52 = vrot.slane %v359_v45, 4  ;;  %v362_v53 = vshll.u32 %v5630_v32, 16  ;;  %v341_v56 = vor.u32 %v340_v47, %v337_v42  ;;  %v5254_v15 = vld [vmem:[%s6850_s1] sm:$0xff]   ;;  %v5695_v24 = vld [vmem:[%s5560_s11 + $0x34] sm:$0xf] }
  0x30   : > { %v323_v55 = vsel %vm5646_vm2, %v318_v46, %v322_v28  ;;  %v351_v57 = vor.u32 %v350_v49, %v346_v48  ;;  %v368_v58 = vshll.u32 %v5639_v38, 16  ;;  %v333_v59 = vsel %vm5646_vm2, %v328_v50, %v332_v30  ;;  %v5716_v50 = vld [vmem:[%s5560_s11 + $0x3c] sm:$0xf]  ;;  %v5887_v27 = vld [vmem:[%s5560_s11 + $0x88] sm:$0xf]  ;;  %s5465_s16 = smov [#allocation4]  }
  0x31   : > { %4453 = vmatpush3.bf16.msra.mxu1 %v5243_v7  ;;  %v364_v60 = vrot.slane %v362_v53, 5  ;;  %v372_v61 = vshrl.u32 %v5639_v38, 16  ;;  %v378_v62 = vshll.u32 %v5652_v44, 16  ;;  %v4042_v0 = vcombine.low %v323_v55, %v333_v59  ;;  %v5255_v55 = vld [vmem:[%s6850_s1 + $0x148] sm:$0xff]   ;;  %6909 = vst [vmem:[#allocation17_spill] sm:$0xff] %v5887_v27  ;;  %s5342_s17 = sshll.u32 %s5465_s16, 4  ;;  %s5343_s17 = int_to_ptr.vmem [resolvable:$false] %s5342_s17 }
  0x32   : > { %4645 = vmatpush3.bf16.msra.mxu0 %v5244_v8  ;;  %4454 = vmatprep.subr.bf16.mxu1 %v5245_v9  ;;  %v342_v1 = vrot.slane %v341_v56, 4  ;;  %v352_v2 = vrot.slane %v351_v57, 4  ;;  %v370_v3 = vrot.slane %v368_v58, 5  ;;  %v383_v16 = vshrl.u32 %v5667_v63, 16  ;;  %v5724_v56 = vld [vmem:[%s5560_s11 + $0x40] sm:$0xf]  ;;  %p5345_p1 = scmp.lt.s32.totalorder %s6716_s7, %s5343_s17 }
  0x33   : > { %4646 = vmatprep.subr.bf16.mxu0 %v5246_v10  ;;  %v365_v5 = vor.u32 %v364_v60, %v361_v52  ;;  %v374_v6 = vrot.slane %v372_v61, 4  ;;  %v380_v7 = vrot.slane %v378_v62, 5  ;;  %4462 = vmatprep.mubr.bf16.mxu1 %v4042_v0  ;;  %v386_v17 = vshll.u32 %v5667_v63, 16  ;;  %v5258_v57 = vld [vmem:[%s6850_s1 + $0x10] sm:$0xff]   ;;  %v5731_v61 = vld [vmem:[%s5560_s11 + $0x44] sm:$0x1] }
  0x34   : > { %v392_v23 = vshll.u32 %v5670_v4, 16  ;;  %v385_v28 = vrot.slane %v383_v16, 4  ;;  %v396_v30 = vshrl.u32 %v5670_v4, 16  ;;  %v420_v49 = vshrl.u32 %v5695_v24, 16  ;;  %s5344_s25 = scalar_lea.vmem %s5343_s17, 8192 }
  0x35   : > { %4455 = vmatpush3.bf16.msra.mxu1 %v5245_v9  ;;  %v5674_v9 = vld [vmem:[%s5560_s11 + $0x2c] sm:$0x1]  ;;  %v366_v20 = vrot.slane %v365_v5, 4  ;;  %v375_v21 = vor.u32 %v374_v6, %v370_v3  ;;  %v388_v29 = vrot.slane %v386_v17, 5  ;;  %v431_v62 = vshrl.u32 %v5716_v50, 16  ;;  %p5346_p3 = scmp.lt.s32.totalorder %s5344_s25, %s5338_s15 }
  0x36   : > { %4647 = vmatpush3.bf16.msra.mxu0 %v5246_v10  ;;  %4456 = vmatprep.subr.bf16.mxu1 %v5247_v11  ;;  %v347_v10 = vsel %vm5646_vm2, %v342_v1, %v346_v48  ;;  %v402_v31 = vshll.u32 %v5674_v9, 16  ;;  %v394_v36 = vrot.slane %v392_v23, 5  ;;  %v398_v42 = vrot.slane %v396_v30, 4  ;;  %v5740_v5 = vld [vmem:[%s5560_s11 + $0x48] sm:$0xf]  ;;  %v5257_v23 = vld [vmem:[%s6850_s1 + $0x150] sm:$0xff]  }
  0x37   : > { %4648 = vmatprep.subr.bf16.mxu0 %v5248_v12  ;;  %v371_v34 = vsel %vm5646_vm2, %v366_v20, %v370_v3  ;;  %v376_v35 = vrot.slane %v375_v21, 4  ;;  %v389_v41 = vor.u32 %v388_v29, %v385_v28  ;;  %v416_v48 = vshll.u32 %v5695_v24, 16  ;;  %v5743_v6 = vld [vmem:[%s5560_s11 + $0x4c] sm:$0xf]  ;;  %p5347_p4 = por %p5346_p3, %p5345_p1 }
  0x38   : > { %v404_v43 = vrot.slane %v402_v31, 5  ;;  %v399_v53 = vor.u32 %v398_v42, %v394_v36  ;;  %v422_v59 = vrot.slane %v420_v49, 4  ;;  %v434_v3 = vshll.u32 %v5716_v50, 16  ;;  %v5260_v31 = vld [vmem:[%s6850_s1 + $0x18] sm:$0xff]  }
  0x39   : > { %4457 = vmatpush3.bf16.msra.mxu1 %v5247_v11  ;;  %v357_v11 = vsel %vm5646_vm2, %v352_v2, %v356_v51  ;;  %v381_v46 = vsel %vm5646_vm2, %v376_v35, %v380_v7  ;;  %v390_v52 = vrot.slane %v389_v41, 4  ;;  %v418_v58 = vrot.slane %v416_v48, 5  ;;  %p5348_p7 = pnand %p5347_p4, %p5341_p0 }
  0x3a   : > { %4649 = vmatpush3.bf16.msra.mxu0 %v5248_v12  ;;  %4458 = vmatprep.subr.bf16.mxu1 %v5249_v18  ;;  %v5253_v12 = vld [vmem:[%s6850_s1 + $0x140] sm:$0xff]   ;;  %v5691_v19 = vcombine.low %v347_v10, %v357_v11  ;;  %v5718_v51 = vcombine.low %v371_v34, %v381_v46  ;;  %v400_v1 = vrot.slane %v399_v53, 4  ;;  %v433_v11 = vrot.slane %v431_v62, 4  ;;  %v5771_v46 = vld [vmem:[%s5560_s11 + $0x54] sm:$0xf] }
  0x3b   : > { %4650 = vmatprep.subr.bf16.mxu0 %v5250_v33  ;;  %v395_v0 = vsel %vm5646_vm2, %v390_v52, %v394_v36  ;;  %v423_v7 = vor.u32 %v422_v59, %v418_v58  ;;  %v436_v20 = vrot.slane %v434_v3, 5  ;;  %v444_v21 = vshrl.u32 %v5724_v56, 16  ;;  %v5776_v53 = vld [vmem:[%s5560_s11 + $0x58] sm:$0xf] }
  0x3c   : > { %6902 = vst [vmem:[#allocation10_spill] sm:$0xff] %v5691_v19  ;;  %4654 = vmatprep.mubr.bf16.mxu0 %v5691_v19  ;;  %6903 = vst [vmem:[#allocation11_spill] sm:$0xff] %v5718_v51  ;;  %v405_v16 = vsel %vm5646_vm2, %v400_v1, %v404_v43  ;;  %v450_v30 = vshll.u32 %v5731_v61, 16  ;;  %v458_v43 = vshll.u32 %v5740_v5, 16  ;;  %v468_v62 = vshrl.u32 %v5743_v6, 16 }
  0x3d   : > { %4459 = vmatpush3.bf16.msra.mxu1 %v5249_v18  ;;  %v5689_v18 = vld [vmem:[%s5560_s11 + $0x30] sm:$0xf]  ;;  %v424_v28 = vrot.slane %v423_v7, 4  ;;  %v437_v35 = vor.u32 %v436_v20, %v433_v11  ;;  %v446_v36 = vrot.slane %v444_v21, 4  ;;  %v479_v3 = vshrl.u32 %v5771_v46, 16  ;;  %v5261_v20 = vld [vmem:[%s6850_s1 + $0x160] sm:$0xff]  }
  0x3e   : > { %4651 = vmatpush3.bf16.msra.mxu0 %v5250_v33  ;;  %4460 = vmatprep.subr.bf16.mxu1 %v5251_v39  ;;  %v5700_v33 = vld [vmem:[%s5560_s11 + $0x38] sm:$0x1]  ;;  %v407_v37 = vshrl.u32 %v5689_v18, 16  ;;  %v410_v45 = vshll.u32 %v5689_v18, 16  ;;  %v452_v42 = vrot.slane %v450_v30, 5  ;;  %v460_v59 = vrot.slane %v458_v43, 5 }
  0x3f   : > { %4652 = vmatprep.subr.bf16.mxu0 %v5252_v54  ;;  %v426_v60 = vshll.u32 %v5700_v33, 16  ;;  %v438_v48 = vrot.slane %v437_v35, 4  ;;  %v482_v7 = vshll.u32 %v5771_v46, 16  ;;  %v492_v30 = vshrl.u32 %v5776_v53, 16 }
  0x40   : > { %v409_v47 = vrot.slane %v407_v37, 4  ;;  %v5761_v37 = vld [vmem:[%s5560_s11 + $0x50] sm:$0x1] }
  0x41   : > { %4461 = vmatpush3.bf16.msra.mxu1 %v5251_v39  ;;  %v5256_v39 = vld [vmem:[%s6850_s1 + $0x8] sm:$0xff]   ;;  %v428_v10 = vrot.slane %v426_v60, 5 }
  0x42   : > { %4653 = vmatpush3.bf16.msra.mxu0 %v5252_v54  ;;  %4494 = vmatprep.subr.bf16.mxu1 %v5254_v15  ;;  %v412_v54 = vrot.slane %v410_v45, 5  ;;  %v464_v45 = vshll.u32 %v5743_v6, 16 }
  0x43   : > { %4686 = vmatprep.subr.bf16.mxu0 %v5253_v12  ;;  %v429_v41 = vsel %vm5646_vm2, %v424_v28, %v428_v10  ;;  %v5799_v10 = vld [vmem:[%s5560_s11 + $0x64] sm:$0xf]  ;;  %v481_v28 = vrot.slane %v479_v3, 4  ;;  %v5825_v3 = vld [vmem:[%s5560_s11 + $0x6c] sm:$0xf] }
  0x44   : > { %4463 = vmatmul.mubr.bf16.vlgmr.msra.gmra.mrb[0].mxu1 %v5691_v19  ;;  %v413_v2 = vor.u32 %v412_v54, %v409_v47  ;;  %v5259_v54 = vld [vmem:[%s6850_s1 + $0x158] sm:$0xff]   ;;  %v466_v60 = vrot.slane %v464_v45, 5 }
  0x45   : > { %4495 = vmatpush3.bf16.msra.mxu1 %v5254_v15  ;;  %4655 = vmatmul.mubr.bf16.vlgmr.msra.gmra.mrb[0].mxu0 %v5718_v51  ;;  %v440_v15 = vshll.u32 %v5724_v56, 16 }
  0x46   : > { %4496 = vmatprep.subr.bf16.mxu1 %v5256_v39  ;;  %4466 = vmatprep.mubr.bf16.mxu1 %v5718_v51  ;;  %v414_v17 = vrot.slane %v413_v2, 4 }
  0x47   : > { %4687 = vmatpush3.bf16.msra.mxu0 %v5253_v12  ;;  %v5752_v12 = vcombine.low %v395_v0, %v405_v16  ;;  %v442_v29 = vrot.slane %v440_v15, 5  ;;  %v5787_v0 = vld [vmem:[%s5560_s11 + $0x5c] sm:$0x1]  ;;  %v470_v15 = vrot.slane %v468_v62, 4 }
  0x48   : > { %4688 = vmatprep.subr.bf16.mxu0 %v5255_v55  ;;  %v419_v34 = vsel %vm5646_vm2, %v414_v17, %v418_v58  ;;  %v5262_v58 = vld [vmem:[%s6850_s1 + $0x20] sm:$0xff]   ;;  %v488_v17 = vshll.u32 %v5776_v53, 16 }
  0x49   : > { %4497 = vmatpush3.bf16.msra.mxu1 %v5256_v39  ;;  %6904 = vst [vmem:[#allocation12_spill] sm:$0xff] %v5752_v12  ;;  %v455_v39 = vshrl.u32 %v5740_v5, 16  ;;  %4658 = vmatprep.mubr.bf16.mxu0 %v5752_v12  ;;  %v5773_v47 = vcombine.low %v419_v34, %v429_v41  ;;  %v447_v49 = vor.u32 %v446_v36, %v442_v29  ;;  %v5264_v34 = vld [vmem:[%s6850_s1 + $0x28] sm:$0xff]  }
  0x4a   : > { %4498 = vmatprep.subr.bf16.mxu1 %v5258_v57  ;;  %v443_v1 = vsel %vm5646_vm2, %v438_v48, %v442_v29  ;;  %v484_v29 = vrot.slane %v482_v7, 5  ;;  %v490_v41 = vrot.slane %v488_v17, 5  ;;  %v516_v17 = vshrl.u32 %v5799_v10, 16 }
  0x4b   : > { %6905 = vst [vmem:[#allocation13_spill] sm:$0xff] %v5773_v47  ;;  %4689 = vmatpush3.bf16.msra.mxu0 %v5255_v55  ;;  %v457_v52 = vrot.slane %v455_v39, 4  ;;  %v474_v55 = vshll.u32 %v5761_v37, 16  ;;  %v448_v2 = vrot.slane %v447_v49, 4  ;;  %v471_v39 = vor.u32 %v470_v15, %v466_v60  ;;  %v5820_v49 = vld [vmem:[%s5560_s11 + $0x68] sm:$0x1] }
  0x4c   : > { %4467 = vmatmul.mubr.bf16.gmra.mrb[4].mxu1 %v5752_v12  ;;  %4690 = vmatprep.subr.bf16.mxu0 %v5257_v23  ;;  %v485_v43 = vor.u32 %v484_v29, %v481_v28  ;;  %v5950_v12 = vld [vmem:[%s5560_s11 + $0xa4] sm:$0x1] }
  0x4d   : > { %4499 = vmatpush3.bf16.msra.mxu1 %v5258_v57  ;;  %v5790_v57 = vld [vmem:[%s5560_s11 + $0x60] sm:$0xf]  ;;  %4659 = vmatmul.mubr.bf16.gmra.mrb[4].mxu0 %v5773_v47  ;;  %v461_v11 = vor.u32 %v460_v59, %v457_v52  ;;  %v476_v16 = vrot.slane %v474_v55, 5  ;;  %v453_v21 = vsel %vm5646_vm2, %v448_v2, %v452_v42  ;;  %v498_v42 = vshll.u32 %v5787_v0, 16  ;;  %6919 = vst [vmem:[#allocation27_spill] sm:$0xff] %v5950_v12 }
  0x4e   : > { %4500 = vmatprep.subr.bf16.mxu1 %v5260_v31  ;;  %4470 = vmatprep.mubr.bf16.mxu1 %v5773_v47  ;;  %v5811_v35 = vcombine.low %v443_v1, %v453_v21  ;;  %v503_v45 = vshrl.u32 %v5790_v57, 16  ;;  %v472_v48 = vrot.slane %v471_v39, 4  ;;  %v506_v52 = vshll.u32 %v5790_v57, 16  ;;  %v5834_v21 = vld [vmem:[%s5560_s11 + $0x70] sm:$0xf] }
  0x4f   : > { %4691 = vmatpush3.bf16.msra.mxu0 %v5257_v23  ;;  %v462_v36 = vrot.slane %v461_v11, 4  ;;  %v494_v23 = vrot.slane %v492_v30, 4  ;;  %v512_v59 = vshll.u32 %v5799_v10, 16  ;;  %v486_v62 = vrot.slane %v485_v43, 4  ;;  %v5845_v30 = vld [vmem:[%s5560_s11 + $0x74] sm:$0x1] }
  0x50   : > { %6906 = vst [vmem:[#allocation14_spill] sm:$0xff] %v5811_v35  ;;  %4692 = vmatprep.subr.bf16.mxu0 %v5259_v54  ;;  %4662 = vmatprep.mubr.bf16.mxu0 %v5811_v35  ;;  %v500_v1 = vrot.slane %v498_v42, 5  ;;  %v505_v2 = vrot.slane %v503_v45, 4  ;;  %v477_v7 = vsel %vm5646_vm2, %v472_v48, %v476_v16  ;;  %v508_v11 = vrot.slane %v506_v52, 5  ;;  %v5853_v45 = vld [vmem:[%s5560_s11 + $0x7c] sm:$0xf] }
  0x51   : > { %4501 = vmatpush3.bf16.msra.mxu1 %v5260_v31  ;;  %v467_v31 = vsel %vm5646_vm2, %v462_v36, %v466_v60  ;;  %v495_v55 = vor.u32 %v494_v23, %v490_v41  ;;  %v5263_v60 = vld [vmem:[%s6850_s1 + $0x168] sm:$0xff]   ;;  %v514_v15 = vrot.slane %v512_v59, 5  ;;  %v491_v28 = vsel %vm5646_vm2, %v486_v62, %v490_v41  ;;  %v5848_v36 = vld [vmem:[%s5560_s11 + $0x78] sm:$0xf] }
  0x52   : > { %4502 = vmatprep.subr.bf16.mxu1 %v5262_v58  ;;  %v522_v16 = vshll.u32 %v5820_v49, 16  ;;  %v509_v39 = vor.u32 %v508_v11, %v505_v2  ;;  %v518_v43 = vrot.slane %v516_v17, 4  ;;  %v527_v23 = vshrl.u32 %v5825_v3, 16 }
  0x53   : > { %4693 = vmatpush3.bf16.msra.mxu0 %v5259_v54  ;;  %v5266_v54 = vld [vmem:[%s6850_s1 + $0x30] sm:$0xff]   ;;  %v496_v29 = vrot.slane %v495_v55, 4  ;;  %v530_v42 = vshll.u32 %v5825_v3, 16  ;;  %v536_v48 = vshll.u32 %v5834_v21, 16  ;;  %v540_v52 = vshrl.u32 %v5834_v21, 16 }
  0x54   : > { %4471 = vmatmul.mubr.bf16.gmra.mrb[8].mxu1 %v5811_v35  ;;  %4694 = vmatprep.subr.bf16.mxu0 %v5261_v20  ;;  %v510_v62 = vrot.slane %v509_v39, 4  ;;  %v519_v55 = vor.u32 %v518_v43, %v514_v15  ;;  %v529_v2 = vrot.slane %v527_v23, 4  ;;  %v546_v8 = vshll.u32 %v5845_v30, 16 }
  0x55   : > { %4503 = vmatpush3.bf16.msra.mxu1 %v5262_v58  ;;  %v5839_v58 = vcombine.low %v467_v31, %v477_v7  ;;  %v501_v41 = vsel %vm5646_vm2, %v496_v29, %v500_v1  ;;  %v524_v31 = vrot.slane %v522_v16, 5  ;;  %v532_v7 = vrot.slane %v530_v42, 5  ;;  %v5265_v1 = vld [vmem:[%s6850_s1 + $0x170] sm:$0xff]   ;;  %v5877_v42 = vld [vmem:[%s5560_s11 + $0x80] sm:$0x1] }
  0x56   : > { %4504 = vmatprep.subr.bf16.mxu1 %v5264_v34  ;;  %v5861_v59 = vcombine.low %v491_v28, %v501_v41  ;;  %v538_v11 = vrot.slane %v536_v48, 5  ;;  %v542_v17 = vrot.slane %v540_v52, 4  ;;  %v5268_v28 = vld [vmem:[%s6850_s1 + $0x38] sm:$0xff]   ;;  %v551_v29 = vshrl.u32 %v5848_v36, 16  ;;  %v5881_v48 = vld [vmem:[%s5560_s11 + $0x84] sm:$0xf] }
  0x57   : > { %6907 = vst [vmem:[#allocation15_spill] sm:$0xff] %v5839_v58  ;;  %4663 = vmatmul.mubr.bf16.gmra.mrb[8].mxu0 %v5839_v58  ;;  %4474 = vmatprep.mubr.bf16.mxu1 %v5839_v58  ;;  %v554_v16 = vshll.u32 %v5848_v36, 16  ;;  %v533_v39 = vor.u32 %v532_v7, %v529_v2  ;;  %v548_v23 = vrot.slane %v546_v8, 5  ;;  %v560_v41 = vshll.u32 %v5853_v45, 16  ;;  %v5267_v8 = vld [vmem:[%s6850_s1 + $0x178] sm:$0xff]  }
  0x58   : > { %6908 = vst [vmem:[#allocation16_spill] sm:$0xff] %v5861_v59  ;;  %4695 = vmatpush3.bf16.msra.mxu0 %v5261_v20  ;;  %4666 = vmatprep.mubr.bf16.mxu0 %v5861_v59  ;;  %v515_v20 = vsel %vm5646_vm2, %v510_v62, %v514_v15  ;;  %v543_v43 = vor.u32 %v542_v17, %v538_v11  ;;  %v553_v15 = vrot.slane %v551_v29, 4  ;;  %v575_v29 = vshrl.u32 %v5881_v48, 16  ;;  %v5918_v58 = vld [vmem:[%s5560_s11 + $0x94] sm:$0xf] }
  0x59   : > { %4505 = vmatpush3.bf16.msra.mxu1 %v5264_v34  ;;  %4696 = vmatprep.subr.bf16.mxu0 %v5263_v60  ;;  %v520_v34 = vrot.slane %v519_v55, 4  ;;  %v556_v62 = vrot.slane %v554_v16, 5  ;;  %v564_v55 = vshrl.u32 %v5853_v45, 16  ;;  %v534_v7 = vrot.slane %v533_v39, 4  ;;  %6914 = vst [vmem:[#allocation22_spill] sm:$0xff] %v5918_v58 }
  0x5a   : > { %4506 = vmatprep.subr.bf16.mxu1 %v5266_v54  ;;  %v544_v17 = vrot.slane %v543_v43, 4  ;;  %v562_v19 = vrot.slane %v560_v41, 5  ;;  %v578_v43 = vshll.u32 %v5881_v48, 16  ;;  %v584_v41 = vshll.u32 %v5887_v27, 16 }
  0x5b   : > { %v525_v52 = vsel %vm5646_vm2, %v520_v34, %v524_v31  ;;  %v5898_v31 = vld [vmem:[%s5560_s11 + $0x90] sm:$0xf]  ;;  %v566_v34 = vrot.slane %v564_v55, 4  ;;  %v539_v16 = vsel %vm5646_vm2, %v534_v7, %v538_v11  ;;  %v5924_v7 = vld [vmem:[%s6850_s1 + $0x180] sm:$0xff]  }
  0x5c   : > { %4475 = vmatmul.mubr.bf16.gmra.mrb[12].mxu1 %v5861_v59  ;;  %4697 = vmatpush3.bf16.msra.mxu0 %v5263_v60  ;;  %v5892_v2 = vcombine.low %v515_v20, %v525_v52  ;;  %v5895_v59 = vld [vmem:[%s5560_s11 + $0x8c] sm:$0x1]  ;;  %6912 = vst [vmem:[#allocation20_spill] sm:$0xff] %v5898_v31  ;;  %v5903_v60 = vld [vmem:[%s6850_s1 + $0x80] sm:$0xff]   ;;  %v570_v20 = vshll.u32 %v5877_v42, 16  ;;  %v549_v39 = vsel %vm5646_vm2, %v544_v17, %v548_v23  ;;  %v580_v35 = vrot.slane %v578_v43, 5 }
  0x5d   : > { %4507 = vmatpush3.bf16.msra.mxu1 %v5266_v54  ;;  %6911 = vst [vmem:[#allocation19_spill] sm:$0xff] %v5895_v59  ;;  %4698 = vmatprep.subr.bf16.mxu0 %v5265_v1  ;;  %v557_v54 = vor.u32 %v556_v62, %v553_v15  ;;  %v5915_v52 = vcombine.low %v539_v16, %v549_v39  ;;  %v586_v11 = vrot.slane %v584_v41, 5  ;;  %v588_v23 = vshrl.u32 %v5887_v27, 16  ;;  %v5939_v43 = vld [vmem:[%s5560_s11 + $0x9c] sm:$0xf] }
  0x5e   : > { %6910 = vst [vmem:[#allocation18_spill] sm:$0xff] %v5892_v2  ;;  %4508 = vmatprep.subr.bf16.mxu1 %v5268_v28  ;;  %4478 = vmatprep.mubr.bf16.mxu1 %v5892_v2  ;;  %v567_v62 = vor.u32 %v566_v34, %v562_v19  ;;  %v572_v55 = vrot.slane %v570_v20, 5  ;;  %v594_v17 = vshll.u32 %v5895_v59, 16  ;;  %v599_v34 = vshrl.u32 %v5898_v31, 16  ;;  %6916 = vst [vmem:[#allocation24_spill] sm:$0xff] %v5939_v43 }
  0x5f   : > { %4667 = vmatmul.mubr.bf16.gmra.mrb[12].mxu0 %v5892_v2  ;;  %6913 = vst [vmem:[#allocation21_spill] sm:$0xff] %v5915_v52  ;;  %v558_v15 = vrot.slane %v557_v54, 4  ;;  %v577_v2 = vrot.slane %v575_v29, 4  ;;  %v5933_v54 = vld [vmem:[%s5560_s11 + $0x98] sm:$0x1]  ;;  %v590_v29 = vrot.slane %v588_v23, 4 }
  0x60   : > { %4699 = vmatpush3.bf16.msra.mxu0 %v5265_v1  ;;  %4670 = vmatprep.mubr.bf16.mxu0 %v5915_v52  ;;  %6915 = vst [vmem:[#allocation23_spill] sm:$0xff] %v5933_v54  ;;  %v602_v16 = vshll.u32 %v5898_v31, 16  ;;  %v608_v39 = vshll.u32 %v5918_v58, 16 }
  0x61   : > { %4509 = vmatpush3.bf16.msra.mxu1 %v5268_v28  ;;  %4700 = vmatprep.subr.bf16.mxu0 %v5267_v8  ;;  %v563_v1 = vsel %vm5646_vm2, %v558_v15, %v562_v19  ;;  %v568_v28 = vrot.slane %v567_v62, 4  ;;  %v581_v20 = vor.u32 %v580_v35, %v577_v2  ;;  %v596_v19 = vrot.slane %v594_v17, 5 }
  0x62   : > { %4542 = vmatprep.subr.bf16.mxu1 %v5903_v60  ;;  %v601_v15 = vrot.slane %v599_v34, 4  ;;  %v612_v62 = vshrl.u32 %v5918_v58, 16  ;;  %v591_v2 = vor.u32 %v590_v29, %v586_v11  ;;  %v604_v23 = vrot.slane %v602_v16, 5  ;;  %v5976_v58 = vld [vmem:[%s5560_s11 + $0xb0] sm:$0x1] }
  0x63   : > { %v573_v41 = vsel %vm5646_vm2, %v568_v28, %v572_v55  ;;  %v582_v35 = vrot.slane %v581_v20, 4  ;;  %v610_v51 = vrot.slane %v608_v39, 5  ;;  %v618_v55 = vshll.u32 %v5933_v54, 16  ;;  %6923 = vst [vmem:[#allocation31_spill] sm:$0xff] %v5976_v58 }
  0x64   : > { %4479 = vmatmul.mubr.bf16.gmra.mrb[16].mxu1 %v5915_v52  ;;  %v5945_v52 = vld [vmem:[%s5560_s11 + $0xa0] sm:$0xf]  ;;  %4701 = vmatpush3.bf16.msra.mxu0 %v5267_v8  ;;  %v5947_v47 = vcombine.low %v563_v1, %v573_v41  ;;  %v614_v31 = vrot.slane %v612_v62, 4  ;;  %v623_v28 = vshrl.u32 %v5939_v43, 16  ;;  %v592_v1 = vrot.slane %v591_v2, 4 }
  0x65   : > { %6917 = vst [vmem:[#allocation25_spill] sm:$0xff] %v5945_v52  ;;  %4734 = vmatprep.subr.bf16.mxu0 %v5924_v7  ;;  %v587_v8 = vsel %vm5646_vm2, %v582_v35, %v586_v11  ;;  %v605_v17 = vor.u32 %v604_v23, %v601_v15  ;;  %v626_v34 = vshll.u32 %v5939_v43, 16  ;;  %v620_v29 = vrot.slane %v618_v55, 5  ;;  %v5962_v41 = vld [vmem:[%s5560_s11 + $0xa8] sm:$0xf] }
  0x66   : > { %6918 = vst [vmem:[#allocation26_spill] sm:$0xff] %v5947_v47  ;;  %4482 = vmatprep.mubr.bf16.mxu1 %v5947_v47  ;;  %v615_v20 = vor.u32 %v614_v31, %v610_v51  ;;  %v625_v16 = vrot.slane %v623_v28, 4  ;;  %v632_v39 = vshll.u32 %v5945_v52, 16  ;;  %6920 = vst [vmem:[#allocation28_spill] sm:$0xff] %v5962_v41  ;;  %v597_v62 = vsel %vm5646_vm2, %v592_v1, %v596_v19  ;;  %v5968_v35 = vld [vmem:[%s5560_s11 + $0xac] sm:$0xf] }
  0x67   : > { %4671 = vmatmul.mubr.bf16.gmra.mrb[16].mxu0 %v5947_v47  ;;  %v606_v47 = vrot.slane %v605_v17, 4  ;;  %v628_v54 = vrot.slane %v626_v34, 5  ;;  %v636_v11 = vshrl.u32 %v5945_v52, 16  ;;  %6921 = vst [vmem:[#allocation29_spill] sm:$0xff] %v5968_v35  ;;  %v5970_v15 = vcombine.low %v587_v8, %v597_v62  ;;  %v5980_v1 = vld [vmem:[%s5560_s11 + $0xb4] sm:$0xf] }
  0x68   : > { %v616_v31 = vrot.slane %v615_v20, 4  ;;  %v634_v2 = vrot.slane %v632_v39, 5  ;;  %v642_v23 = vshll.u32 %v5950_v12, 16  ;;  %v647_v19 = vshrl.u32 %v5962_v41, 16  ;;  %6924 = vst [vmem:[#allocation32_spill] sm:$0xff] %v5980_v1 }
  0x69   : > { %6922 = vst [vmem:[#allocation30_spill] sm:$0xff] %v5970_v15  ;;  %v611_v55 = vsel %vm5646_vm2, %v606_v47, %v610_v51  ;;  %v629_v28 = vor.u32 %v628_v54, %v625_v16  ;;  %v638_v43 = vrot.slane %v636_v11, 4  ;;  %4674 = vmatprep.mubr.bf16.mxu0 %v5970_v15  ;;  %v650_v51 = vshll.u32 %v5962_v41, 16  ;;  %v5989_v54 = vld [vmem:[%s5560_s11 + $0xb8] sm:$0xf] }
  0x6a   : > { %v621_v8 = vsel %vm5646_vm2, %v616_v31, %v620_v29  ;;  %v644_v17 = vrot.slane %v642_v23, 5  ;;  %v656_v47 = vshll.u32 %v5968_v35, 16  ;;  %v649_v39 = vrot.slane %v647_v19, 4  ;;  %v5996_v23 = vld [vmem:[%s5560_s11 + $0xbc] sm:$0x1] }
  0x6b   : > { %v5991_v34 = vcombine.low %v611_v55, %v621_v8  ;;  %v630_v20 = vrot.slane %v629_v28, 4  ;;  %v639_v16 = vor.u32 %v638_v43, %v634_v2  ;;  %v652_v62 = vrot.slane %v650_v51, 5  ;;  %v6008_v8 = vld [vmem:[%s5560_s11 + $0xc4] sm:$0xf] }
  0x6c   : > { %4483 = vmatmul.mubr.bf16.gmra.mrb[20].mxu1 %v5970_v15  ;;  %v658_v11 = vrot.slane %v656_v47, 5  ;;  %v660_v29 = vshrl.u32 %v5968_v35, 16  ;;  %v666_v31 = vshll.u32 %v5976_v58, 16  ;;  %v5999_v15 = vld [vmem:[%s5560_s11 + $0xc0] sm:$0xf]  ;;  %v671_v43 = vshrl.u32 %v5980_v1, 16 }
  0x6d   : > { %6925 = vst [vmem:[#allocation33_spill] sm:$0xff] %v5991_v34  ;;  %4486 = vmatprep.mubr.bf16.mxu1 %v5991_v34  ;;  %v635_v55 = vsel %vm5646_vm2, %v630_v20, %v634_v2  ;;  %v640_v28 = vrot.slane %v639_v16, 4  ;;  %v674_v19 = vshll.u32 %v5980_v1, 16  ;;  %v653_v51 = vor.u32 %v652_v62, %v649_v39  ;;  %v6017_v1 = vld [vmem:[%s5560_s11 + $0xc8] sm:$0x1] }
  0x6e   : > { %v662_v47 = vrot.slane %v660_v29, 4  ;;  %v668_v58 = vrot.slane %v666_v31, 5  ;;  %v680_v35 = vshll.u32 %v5989_v54, 16  ;;  %v684_v2 = vshrl.u32 %v5989_v54, 16 }
  0x6f   : > { %4675 = vmatmul.mubr.bf16.gmra.mrb[20].mxu0 %v5991_v34  ;;  %v645_v41 = vsel %vm5646_vm2, %v640_v28, %v644_v17  ;;  %v673_v34 = vrot.slane %v671_v43, 4  ;;  %v676_v12 = vrot.slane %v674_v19, 5  ;;  %v654_v16 = vrot.slane %v653_v51, 4 }
  0x70   : > { %v6014_v20 = vcombine.low %v635_v55, %v645_v41  ;;  %v663_v52 = vor.u32 %v662_v47, %v658_v11  ;;  %v682_v59 = vrot.slane %v680_v35, 5  ;;  %v686_v39 = vrot.slane %v684_v2, 4 }
  0x71   : > { %v677_v27 = vor.u32 %v676_v12, %v673_v34  ;;  %v690_v62 = vshll.u32 %v5996_v23, 16  ;;  %v2004_v29 = vshrl.u32 %v5999_v15, 16  ;;  %v659_v17 = vsel %vm5646_vm2, %v654_v16, %v658_v11 }
  0x72   : > { %4678 = vmatprep.mubr.bf16.mxu0 %v6014_v20  ;;  %v664_v41 = vrot.slane %v663_v52, 4  ;;  %v2007_v31 = vshll.u32 %v5999_v15, 16  ;;  %v2013_v35 = vshll.u32 %v6008_v8, 16  ;;  %v687_v28 = vor.u32 %v686_v39, %v682_v59 }
  0x73   : > { %v678_v55 = vrot.slane %v677_v27, 4  ;;  %v692_v12 = vrot.slane %v690_v62, 5  ;;  %v2006_v34 = vrot.slane %v2004_v29, 4  ;;  %v2017_v47 = vshrl.u32 %v6008_v8, 16 }
  0x74   : > { %4487 = vmatmul.mubr.bf16.gmra.mrb[24].mxu1 %v6014_v20  ;;  %v669_v43 = vsel %vm5646_vm2, %v664_v41, %v668_v58  ;;  %v2009_v19 = vrot.slane %v2007_v31, 5  ;;  %v2015_v51 = vrot.slane %v2013_v35, 5  ;;  %v688_v11 = vrot.slane %v687_v28, 4 }
  0x75   : > { %v6030_v2 = vcombine.low %v659_v17, %v669_v43  ;;  %v683_v52 = vsel %vm5646_vm2, %v678_v55, %v682_v59  ;;  %v2023_v16 = vshll.u32 %v6017_v1, 16  ;;  %v2019_v58 = vrot.slane %v2017_v47, 4 }
  0x76   : > { %v2010_v39 = vor.u32 %v2009_v19, %v2006_v34  ;;  %v4091_v62 = vrot.slane %v5618_v22, 9  ;;  %v1316_v29 = vrot.slane %v5621_v25, 5  ;;  %v693_v59 = vsel %vm5646_vm2, %v688_v11, %v692_v12 }
  0x77   : > { %4679 = vmatmul.mubr.bf16.gmra.mrb[24].mxu0 %v6030_v2  ;;  %4490 = vmatprep.mubr.bf16.mxu1 %v6030_v2  ;;  %v2025_v17 = vrot.slane %v2023_v16, 5  ;;  %v1319_v41 = vrot.slane %v5624_v26, 5  ;;  %v6050_v31 = vcombine.low %v5618_v22, %v5621_v25  ;;  %v6052_v35 = vcombine.low %v683_v52, %v693_v59 }
  0x78   : > { %v2011_v55 = vrot.slane %v2010_v39, 4  ;;  %v2020_v28 = vor.u32 %v2019_v58, %v2015_v51  ;;  %v1317_v34 = vsel %vm6037_vm5, %v4091_v62, %v1316_v29  ;;  %v1318_v43 = vrot.slane %v1316_v29, 4 }
  0x79   : > { %v4092_v19 = vrot.slane %v5630_v32, 9  ;;  %v1323_v47 = vrot.slane %v5639_v38, 5  ;;  %v6060_v12 = vcombine.low %v5630_v32, %v5639_v38  ;;  %4682 = vmatprep.mubr.bf16.mxu0 %v6052_v35  ;;  %v4093_v26 = vrot.slane %v5667_v63, 9 }
  0x7a   : > { %v2016_v22 = vsel %vm5646_vm2, %v2011_v55, %v2015_v51  ;;  %v2021_v25 = vrot.slane %v2020_v28, 4  ;;  %v1330_v52 = vrot.slane %v5670_v4, 5  ;;  %v6928_v11 = vcombine.low %v5604_v13, %v5607_v14 }
  0x7b   : > { %v1320_v32 = vsel %vm6037_vm5, %v1318_v43, %v1319_v41  ;;  %v1324_v38 = vsel %vm6037_vm5, %v4092_v19, %v1323_v47  ;;  %v1325_v16 = vrot.slane %v1323_v47, 4  ;;  %v1333_v39 = vrot.slane %v5674_v9, 5 }
  0x7c   : > { %4491 = vmatmul.mubr.bf16.gmra.mrb[28].mxu1 %v6052_v35  ;;  %v2026_v51 = vsel %vm5646_vm2, %v2021_v25, %v2025_v17  ;;  %v6078_v58 = vcombine.low %v1317_v34, %v1320_v32  ;;  %v1331_v62 = vsel %vm6037_vm5, %v4093_v26, %v1330_v52  ;;  %v1332_v29 = vrot.slane %v1330_v52, 4 }
  0x7d   : > { %4510 = vmatprep.mubr.bf16.mxu1 %v6928_v11  ;;  %v6082_v13 = vcombine.low %v2016_v22, %v2026_v51  ;;  %v6929_v14 = vrot.slane %v5652_v44, 5  ;;  %v6090_v41 = vcombine.low %v5667_v63, %v5670_v4  ;;  %v4094_v9 = vrot.slane %v5689_v18, 9  ;;  %v5276_v44 = vld [vmem:[%s6850_s1 + $0x88] sm:$0xff]  }
  0x7e   : > { %v1334_v55 = vsel %vm6037_vm5, %v1332_v29, %v1333_v39  ;;  %v1337_v28 = vrot.slane %v5695_v24, 5  ;;  %v1340_v34 = vrot.slane %v5700_v33, 5  ;;  %v6107_v63 = vcombine.low %v5689_v18, %v5695_v24  ;;  %v5280_v29 = vld [vmem:[%s6850_s1 + $0x90] sm:$0xff]  }
  0x7f   : > { %v1327_v59 = vsel %vm6037_vm5, %v1325_v16, %v6929_v14  ;;  %4683 = vmatmul.mubr.bf16.gmra.mrb[28].mxu0 %v6082_v13  ;;  %v6103_v43 = vcombine.low %v1331_v62, %v1334_v55  ;;  %v4095_v4 = vrot.slane %v5716_v50, 9  ;;  %v1344_v19 = vrot.slane %v5724_v56, 5 }
  0x80   : > { %v6093_v17 = vcombine.low %v1324_v38, %v1327_v59  ;;  %4702 = vmatprep.mubr.bf16.mxu0 %v6078_v58  ;;  %v1338_v33 = vsel %vm6037_vm5, %v4094_v9, %v1337_v28  ;;  %v1339_v47 = vrot.slane %v1337_v28, 4  ;;  %v1347_v22 = vrot.slane %v5731_v61, 5  ;;  %v5275_v38 = vld [vmem:[%s6850_s1 + $0x188] sm:$0xff]  }
  0x81   : > { %v6117_v25 = vcombine.low %v5716_v50, %v5724_v56  ;;  %v1345_v18 = vsel %vm6037_vm5, %v4095_v4, %v1344_v19  ;;  %v1346_v24 = vrot.slane %v1344_v19, 4  ;;  %v4096_v26 = vrot.slane %v5740_v5, 9 }
  0x82   : > { %v1351_v52 = vrot.slane %v5743_v6, 5  ;;  %v1341_v11 = vsel %vm6037_vm5, %v1339_v47, %v1340_v34  ;;  %v1354_v32 = vrot.slane %v5761_v37, 5  ;;  %v6129_v61 = vcombine.low %v5740_v5, %v5743_v6  ;;  %v5279_v47 = vld [vmem:[%s6850_s1 + $0x190] sm:$0xff]  }
  0x83   : > { %v4097_v50 = vrot.slane %v5771_v46, 9  ;;  %v6134_v56 = vcombine.low %v1338_v33, %v1341_v11  ;;  %v1348_v16 = vsel %vm6037_vm5, %v1346_v24, %v1347_v22  ;;  %v1361_v39 = vrot.slane %v5787_v0, 5 }
  0x84   : > { %4511 = vmatmul.mubr.bf16.vlgmr.msra.gmra.mrb[0].mxu1 %v6050_v31  ;;  %v1352_v37 = vsel %vm6037_vm5, %v4096_v26, %v1351_v52  ;;  %v1353_v5 = vrot.slane %v1351_v52, 4  ;;  %v6143_v6 = vcombine.low %v1345_v18, %v1348_v16  ;;  %v6149_v51 = vcombine.low %v5771_v46, %v5776_v53  ;;  %v6931_v16 = vld [vmem:[#allocation19_spill] sm:$0xff] }
  0x85   : > { %4543 = vmatpush3.bf16.msra.mxu1 %v5903_v60  ;;  %4514 = vmatprep.mubr.bf16.mxu1 %v6060_v12  ;;  %v1358_v60 = vrot.slane %v5776_v53, 5  ;;  %v4098_v14 = vrot.slane %v5790_v57, 9  ;;  %v1365_v59 = vrot.slane %v5799_v10, 5  ;;  %v1368_v9 = vrot.slane %v5820_v49, 5  ;;  %v5284_v49 = vld [vmem:[%s6850_s1 + $0x98] sm:$0xff]  }
  0x86   : > { %4544 = vmatprep.subr.bf16.mxu1 %v5276_v44  ;;  %v1355_v62 = vsel %vm6037_vm5, %v1353_v5, %v1354_v32  ;;  %v6165_v53 = vcombine.low %v5790_v57, %v5799_v10  ;;  %v4099_v4 = vrot.slane %v5825_v3, 9  ;;  %v1372_v19 = vrot.slane %v5834_v21, 5  ;;  %v6930_v32 = vld [vmem:[#allocation17_spill] sm:$0xff] }
  0x87   : > { %v6159_v55 = vcombine.low %v1352_v37, %v1355_v62  ;;  %v1359_v0 = vsel %vm6037_vm5, %v4097_v50, %v1358_v60  ;;  %v1360_v46 = vrot.slane %v1358_v60, 4  ;;  %4703 = vmatmul.mubr.bf16.vlgmr.msra.gmra.mrb[0].mxu0 %v6093_v17  ;;  %v1366_v28 = vsel %vm6037_vm5, %v4098_v14, %v1365_v59 }
  0x88   : > { %v1367_v34 = vrot.slane %v1365_v59, 4  ;;  %4735 = vmatpush3.bf16.msra.mxu0 %v5924_v7  ;;  %4706 = vmatprep.mubr.bf16.mxu0 %v6103_v43  ;;  %v1375_v10 = vrot.slane %v5845_v30, 5  ;;  %v4100_v33 = vrot.slane %v5848_v36, 9  ;;  %v1373_v30 = vsel %vm6037_vm5, %v4099_v4, %v1372_v19  ;;  %v6933_v59 = vld [vmem:[#allocation22_spill] sm:$0xff] }
  0x89   : > { %4545 = vmatpush3.bf16.msra.mxu1 %v5276_v44  ;;  %v1362_v57 = vsel %vm6037_vm5, %v1360_v46, %v1361_v39  ;;  %v6182_v44 = vcombine.low %v5825_v3, %v5834_v21  ;;  %4736 = vmatprep.subr.bf16.mxu0 %v5275_v38  ;;  %v1374_v18 = vrot.slane %v1372_v19, 4  ;;  %v1379_v21 = vrot.slane %v5853_v45, 5  ;;  %v6934_v46 = vld [vmem:[#allocation23_spill] sm:$0xff] }
  0x8a   : > { %4546 = vmatprep.subr.bf16.mxu1 %v5280_v29  ;;  %v6188_v7 = vcombine.low %v1359_v0, %v1362_v57  ;;  %v1369_v22 = vsel %vm6037_vm5, %v1367_v34, %v1368_v9  ;;  %v1382_v24 = vrot.slane %v5877_v42, 5  ;;  %v6201_v26 = vcombine.low %v5848_v36, %v5853_v45  ;;  %v5283_v42 = vld [vmem:[%s6850_s1 + $0x198] sm:$0xff]   ;;  %v6935_v34 = vld [vmem:[#allocation24_spill] sm:$0xff] }
  0x8b   : > { %v6195_v3 = vcombine.low %v1366_v28, %v1369_v22  ;;  %v1376_v52 = vsel %vm6037_vm5, %v1374_v18, %v1375_v10  ;;  %v4101_v11 = vrot.slane %v5881_v48, 9  ;;  %v1386_v50 = vrot.slane %v6930_v32, 5  ;;  %v5292_v22 = vld [vmem:[%s6850_s1 + $0xa8] sm:$0xff]  }
  0x8c   : > { %4515 = vmatmul.mubr.bf16.gmra.mrb[4].mxu1 %v6090_v41  ;;  %v1389_v37 = vrot.slane %v6931_v16, 5  ;;  %4737 = vmatpush3.bf16.msra.mxu0 %v5275_v38  ;;  %v6212_v36 = vcombine.low %v1373_v30, %v1376_v52  ;;  %v1380_v45 = vsel %vm6037_vm5, %v4100_v33, %v1379_v21  ;;  %v1381_v5 = vrot.slane %v1379_v21, 4  ;;  %v5288_v38 = vld [vmem:[%s6850_s1 + $0xa0] sm:$0xff]   ;;  %v6936_v18 = vld [vmem:[#allocation25_spill] sm:$0xff] }
  0x8d   : > { %4518 = vmatprep.mubr.bf16.mxu1 %v6107_v63  ;;  %4547 = vmatpush3.bf16.msra.mxu1 %v5280_v29  ;;  %v6218_v60 = vcombine.low %v5881_v48, %v6930_v32  ;;  %v1387_v39 = vsel %vm6037_vm5, %v4101_v11, %v1386_v50  ;;  %v1388_v62 = vrot.slane %v1386_v50, 4  ;;  %v6932_v29 = vld [vmem:[#allocation20_spill] sm:$0xff]  ;;  %v1393_v9 = vrot.slane %v6933_v59, 5  ;;  %v6937_v21 = vld [vmem:[#allocation27_spill] sm:$0xff]  ;;  %v6939_v16 = vld [vmem:[#allocation29_spill] sm:$0xff] }
  0x8e   : > { %4548 = vmatprep.subr.bf16.mxu1 %v5284_v49  ;;  %4738 = vmatprep.subr.bf16.mxu0 %v5279_v47  ;;  %v4102_v14 = vrot.slane %v6932_v29, 9  ;;  %v1383_v0 = vsel %vm6037_vm5, %v1381_v5, %v1382_v24  ;;  %v1396_v28 = vrot.slane %v6934_v46, 5  ;;  %v6232_v48 = vcombine.low %v6932_v29, %v6933_v59  ;;  %v5287_v11 = vld [vmem:[%s6850_s1 + $0x1a0] sm:$0xff]  }
  0x8f   : > { %v4103_v4 = vrot.slane %v6935_v34, 9  ;;  %4707 = vmatmul.mubr.bf16.gmra.mrb[4].mxu0 %v6134_v56  ;;  %v6236_v19 = vcombine.low %v1380_v45, %v1383_v0  ;;  %v1390_v57 = vsel %vm6037_vm5, %v1388_v62, %v1389_v37  ;;  %v1395_v33 = vrot.slane %v1393_v9, 4  ;;  %v6940_v45 = vld [vmem:[#allocation31_spill] sm:$0xff]  ;;  %v6941_v0 = vld [vmem:[#allocation32_spill] sm:$0xff] }
  0x90   : > { %v1394_v10 = vsel %vm6037_vm5, %v4102_v14, %v1393_v9  ;;  %4710 = vmatprep.mubr.bf16.mxu0 %v6143_v6  ;;  %4739 = vmatpush3.bf16.msra.mxu0 %v5279_v47  ;;  %v6246_v30 = vcombine.low %v1387_v39, %v1390_v57  ;;  %v1403_v24 = vrot.slane %v6937_v21, 5  ;;  %v6252_v52 = vcombine.low %v6935_v34, %v6936_v18  ;;  %v6938_v47 = vld [vmem:[#allocation28_spill] sm:$0xff] }
  0x91   : > { %4549 = vmatpush3.bf16.msra.mxu1 %v5284_v49  ;;  %v1400_v49 = vrot.slane %v6936_v18, 5  ;;  %4740 = vmatprep.subr.bf16.mxu0 %v5283_v42  ;;  %v1397_v32 = vsel %vm6037_vm5, %v1395_v33, %v1396_v28  ;;  %v4104_v50 = vrot.slane %v6938_v47, 9  ;;  %v1407_v37 = vrot.slane %v6939_v16, 5  ;;  %v5291_v34 = vld [vmem:[%s6850_s1 + $0x1a8] sm:$0xff]   ;;  %v5296_v18 = vld [vmem:[%s6850_s1 + $0xb0] sm:$0xff]  }
  0x92   : > { %4550 = vmatprep.subr.bf16.mxu1 %v5288_v38  ;;  %v1410_v5 = vrot.slane %v6940_v45, 5  ;;  %v6263_v39 = vcombine.low %v1394_v10, %v1397_v32  ;;  %v6269_v14 = vcombine.low %v6938_v47, %v6939_v16  ;;  %v4105_v46 = vrot.slane %v6941_v0, 9  ;;  %v5302_v45 = vld [vmem:[%s6850_s1 + $0xc0] sm:$0xff]  }
  0x93   : > { %v1401_v62 = vsel %vm6037_vm5, %v4103_v4, %v1400_v49  ;;  %v1402_v29 = vrot.slane %v1400_v49, 4  ;;  %v1408_v59 = vsel %vm6037_vm5, %v4104_v50, %v1407_v37  ;;  %v1409_v9 = vrot.slane %v1407_v37, 4 }
  0x94   : > { %4519 = vmatmul.mubr.bf16.gmra.mrb[8].mxu1 %v6117_v25  ;;  %v1414_v28 = vrot.slane %v5989_v54, 5  ;;  %4741 = vmatpush3.bf16.msra.mxu0 %v5283_v42  ;;  %v1417_v57 = vrot.slane %v5996_v23, 5  ;;  %v4148_v10 = vrot.slane %v5999_v15, 9  ;;  %v6305_v47 = vcombine.low %v5999_v15, %v6008_v8 }
  0x95   : > { %4522 = vmatprep.mubr.bf16.mxu1 %v6129_v61  ;;  %4551 = vmatpush3.bf16.msra.mxu1 %v5288_v38  ;;  %v1404_v4 = vsel %vm6037_vm5, %v1402_v29, %v1403_v24  ;;  %v6284_v38 = vcombine.low %v6941_v0, %v5989_v54  ;;  %v1411_v42 = vsel %vm6037_vm5, %v1409_v9, %v1410_v5  ;;  %v2291_v54 = vrot.slane %v6008_v8, 5  ;;  %v5301_v5 = vld [vmem:[%s6850_s1 + $0x1c0] sm:$0xff]  }
  0x96   : > { %4552 = vmatprep.subr.bf16.mxu1 %v5292_v22  ;;  %4742 = vmatprep.subr.bf16.mxu0 %v5287_v11  ;;  %v6287_v33 = vcombine.low %v1401_v62, %v1404_v4  ;;  %v1415_v49 = vsel %vm6037_vm5, %v4105_v46, %v1414_v28  ;;  %v1416_v23 = vrot.slane %v1414_v28, 4  ;;  %v6296_v21 = vcombine.low %v1408_v59, %v1411_v42  ;;  %v5335_v62 = vld [vmem:[%s5560_s11 + $0x4] sm:$0xf]  ;;  %v5336_v59 = vld [vmem:[%s5560_s11 + $0x8] sm:$0x1] }
  0x97   : > { %v2294_v24 = vrot.slane %v6017_v1, 5  ;;  %4711 = vmatmul.mubr.bf16.gmra.mrb[8].mxu0 %v6159_v55  ;;  %v2292_v16 = vsel %vm6037_vm5, %v4148_v10, %v2291_v54  ;;  %v2293_v37 = vrot.slane %v2291_v54, 4  ;;  %v5300_v1 = vld [vmem:[%s6850_s1 + $0xb8] sm:$0xff]   ;;  %v1309_v29 = vrot.slane %v5335_v62, 5  ;;  %v5337_v0 = vld [vmem:[%s5560_s11] sm:$0xf] }
  0x98   : > { %v1418_v32 = vsel %vm6037_vm5, %v1416_v23, %v1417_v57  ;;  %4714 = vmatprep.mubr.bf16.mxu0 %v6188_v7  ;;  %4743 = vmatpush3.bf16.msra.mxu0 %v5287_v11  ;;  %v5299_v11 = vld [vmem:[%s6850_s1 + $0x1b8] sm:$0xff]   ;;  %v1312_v9 = vrot.slane %v5336_v59, 5  ;;  %v4090_v46 = vrot.slane %v5337_v0, 9  ;;  %v5304_v10 = vld [vmem:[%s6850_s1 + $0xc8] sm:$0xff]   ;;  %v5310_v54 = vld [vmem:[%s6850_s1 + $0xe0] sm:$0xff]  }
  0x99   : > { %4553 = vmatpush3.bf16.msra.mxu1 %v5292_v22  ;;  %v6308_v50 = vcombine.low %v1415_v49, %v1418_v32  ;;  %4744 = vmatprep.subr.bf16.mxu0 %v5291_v34  ;;  %v5295_v22 = vld [vmem:[%s6850_s1 + $0x1b0] sm:$0xff]   ;;  %v2295_v15 = vsel %vm6037_vm5, %v2293_v37, %v2294_v24  ;;  %v1311_v28 = vrot.slane %v1309_v29, 4  ;;  %v5303_v42 = vld [vmem:[%s6850_s1 + $0x1c8] sm:$0xff]   ;;  %v5307_v23 = vld [vmem:[%s6850_s1 + $0x1d8] sm:$0xff]  }
  0x9a   : > { %4554 = vmatprep.subr.bf16.mxu1 %v5296_v18  ;;  %v6322_v8 = vcombine.low %v2292_v16, %v2295_v15  ;;  %v5305_v49 = vld [vmem:[%s6850_s1 + $0x1d0] sm:$0xff]   ;;  %v5312_v24 = vld [vmem:[%s6850_s1 + $0xe8] sm:$0xff]   ;;  %v5309_v32 = vld [vmem:[%s6850_s1 + $0x1e0] sm:$0xff]  }
  0x9b   : > { %v1313_v4 = vsel %vm6037_vm5, %v1311_v28, %v1312_v9  ;;  %v5311_v16 = vld [vmem:[%s6850_s1 + $0x1e8] sm:$0xff]   ;;  %v5314_v37 = vld [vmem:[%s6850_s1 + $0xf0] sm:$0xff]   ;;  %v5317_v15 = vld [vmem:[%s6850_s1 + $0x1f8] sm:$0xff]  }
  0x9c   : > { %4523 = vmatmul.mubr.bf16.gmra.mrb[12].mxu1 %v6149_v51  ;;  %4745 = vmatpush3.bf16.msra.mxu0 %v5291_v34  ;;  %v1310_v34 = vsel %vm6037_vm5, %v4090_v46, %v1309_v29  ;;  %v6437_v62 = vld [vmem:[%s5560_s11 + $0xd0] sm:$0xf]  ;;  %v6942_v59 = vld [vmem:[#allocation11_spill] sm:$0xff]  ;;  %v5322_v9 = vld [vmem:[%s6851_s2 + $0x8] sm:$0xff]  }
  0x9d   : > { %4526 = vmatprep.mubr.bf16.mxu1 %v6165_v53  ;;  %4555 = vmatpush3.bf16.msra.mxu1 %v5296_v18  ;;  %v4106_v57 = vcombine.low %v1310_v34, %v1313_v4  ;;  %v5306_v18 = vld [vmem:[%s6850_s1 + $0xd0] sm:$0xff]   ;;  %v5321_v0 = vld [vmem:[%s6850_s1 + $0x208] sm:$0xff]   ;;  %v5325_v34 = vld [vmem:[%s6850_s1 + $0x218] sm:$0xff]   ;;  %v3108_v40 = vrot.slane %v6437_v62, 5 }
  0x9e   : > { %4556 = vmatprep.subr.bf16.mxu1 %v5300_v1  ;;  %4746 = vmatprep.subr.bf16.mxu0 %v5295_v22  ;;  %v6943_v46 = vld [vmem:[#allocation12_spill] sm:$0xff]  ;;  %v6944_v28 = vld [vmem:[#allocation13_spill] sm:$0xff] }
  0x9f   : > { %4715 = vmatmul.mubr.bf16.gmra.mrb[12].mxu0 %v6195_v3  ;;  %v5328_v4 = vld [vmem:[%s6851_s2 + $0x20] sm:$0xff]  }
  0xa0   : > { %4718 = vmatprep.mubr.bf16.mxu0 %v6212_v36  ;;  %4747 = vmatpush3.bf16.msra.mxu0 %v5295_v22  ;;  %v5313_v22 = vld [vmem:[%s6850_s1 + $0x1f0] sm:$0xff]  }
  0xa1   : > { %4557 = vmatpush3.bf16.msra.mxu1 %v5300_v1  ;;  %4748 = vmatprep.subr.bf16.mxu0 %v5299_v11  ;;  %v5318_v1 = vld [vmem:[%s6850_s1 + $0xf8] sm:$0xff]  }
  0xa2   : > { %4590 = vmatprep.subr.bf16.mxu1 %v5302_v45 }
  0xa4   : > { %4527 = vmatmul.mubr.bf16.gmra.mrb[16].mxu1 %v6182_v44  ;;  %4749 = vmatpush3.bf16.msra.mxu0 %v5299_v11  ;;  %v5320_v11 = vld [vmem:[%s6851_s2] sm:$0xff]  }
  0xa5   : > { %4530 = vmatprep.mubr.bf16.mxu1 %v6201_v26  ;;  %4782 = vmatprep.subr.bf16.mxu0 %v5301_v5 }
  0xa7   : > { %4719 = vmatmul.mubr.bf16.gmra.mrb[16].mxu0 %v6236_v19 }
  0xa8   : > { %4722 = vmatprep.mubr.bf16.mxu0 %v6246_v30 }
  0xac   : > { %4531 = vmatmul.mubr.bf16.gmra.mrb[20].mxu1 %v6218_v60 }
  0xad   : > { %4534 = vmatprep.mubr.bf16.mxu1 %v6232_v48 }
  0xaf   : > { %4723 = vmatmul.mubr.bf16.gmra.mrb[20].mxu0 %v6263_v39 }
  0xb0   : > { %4726 = vmatprep.mubr.bf16.mxu0 %v6287_v33 }
  0xb4   : > { %4535 = vmatmul.mubr.bf16.gmra.mrb[24].mxu1 %v6252_v52 }
  0xb5   : > { %4538 = vmatprep.mubr.bf16.mxu1 %v6269_v14 }
  0xb7   : > { %4727 = vmatmul.mubr.bf16.gmra.mrb[24].mxu0 %v6296_v21 }
  0xb8   : > { %4730 = vmatprep.mubr.bf16.mxu0 %v6308_v50 }
  0xbc   : > { %4539 = vmatmul.mubr.bf16.gmra.mrb[28].mxu1 %v6284_v38 }
  0xbd   : > { %4558 = vmatprep.mubr.bf16.mxu1 %v4106_v57  ;;  %v6945_v57 = vld [vmem:[#allocation14_spill] sm:$0xff] }
  0xbf   : > { %4731 = vmatmul.mubr.bf16.gmra.mrb[28].mxu0 %v6322_v8 }
  0xc0   : > { %4750 = vmatprep.mubr.bf16.mxu0 %v6060_v12 }
  0xc4   : > { %4559 = vmatmul.mubr.bf16.vlgmr.msra.gmra.mrb[0].mxu1 %v6078_v58  ;;  %v5308_v58 = vld [vmem:[%s6850_s1 + $0xd8] sm:$0xff]  }
  0xc5   : > { %4591 = vmatpush3.bf16.msra.mxu1 %v5302_v45  ;;  %4562 = vmatprep.mubr.bf16.mxu1 %v6093_v17  ;;  %v5319_v45 = vld [vmem:[%s6850_s1 + $0x200] sm:$0xff]  }
  0xc6   : > { %4592 = vmatprep.subr.bf16.mxu1 %v5304_v10 }
  0xc7   : > { %4751 = vmatmul.mubr.bf16.vlgmr.msra.gmra.mrb[0].mxu0 %v6090_v41 }
  0xc8   : > { %4783 = vmatpush3.bf16.msra.mxu0 %v5301_v5  ;;  %4754 = vmatprep.mubr.bf16.mxu0 %v6107_v63  ;;  %v6434_v5 = vld [vmem:[%s5560_s11 + $0xcc] sm:$0xf] }
  0xc9   : > { %4593 = vmatpush3.bf16.msra.mxu1 %v5304_v10  ;;  %4784 = vmatprep.subr.bf16.mxu0 %v5303_v42  ;;  %v4158_v29 = vcombine.low %v6434_v5, %v6437_v62  ;;  %v6946_v10 = vld [vmem:[#allocation15_spill] sm:$0xff] }
  0xca   : > { %4594 = vmatprep.subr.bf16.mxu1 %v5306_v18 }
  0xcc   : > { %4563 = vmatmul.mubr.bf16.gmra.mrb[4].mxu1 %v6103_v43  ;;  %4785 = vmatpush3.bf16.msra.mxu0 %v5303_v42  ;;  %v5329_v42 = vld [vmem:[%s6850_s1 + $0x228] sm:$0xff]  }
  0xcd   : > { %4566 = vmatprep.mubr.bf16.mxu1 %v6134_v56  ;;  %4595 = vmatpush3.bf16.msra.mxu1 %v5306_v18  ;;  %v5332_v18 = vld [vmem:[%s6851_s2 + $0x30] sm:$0xff]  }
  0xce   : > { %4596 = vmatprep.subr.bf16.mxu1 %v5308_v58  ;;  %4786 = vmatprep.subr.bf16.mxu0 %v5305_v49 }
  0xcf   : > { %4755 = vmatmul.mubr.bf16.gmra.mrb[4].mxu0 %v6117_v25 }
  0xd0   : > { %4758 = vmatprep.mubr.bf16.mxu0 %v6129_v61  ;;  %4787 = vmatpush3.bf16.msra.mxu0 %v5305_v49  ;;  %v6948_v49 = vld [vmem:[#allocation18_spill] sm:$0xff] }
  0xd1   : > { %4597 = vmatpush3.bf16.msra.mxu1 %v5308_v58  ;;  %4788 = vmatprep.subr.bf16.mxu0 %v5307_v23  ;;  %v6947_v58 = vld [vmem:[#allocation16_spill] sm:$0xff] }
  0xd2   : > { %4598 = vmatprep.subr.bf16.mxu1 %v5310_v54 }
  0xd4   : > { %4567 = vmatmul.mubr.bf16.gmra.mrb[8].mxu1 %v6143_v6  ;;  %4789 = vmatpush3.bf16.msra.mxu0 %v5307_v23  ;;  %v5333_v23 = vld [vmem:[%s6850_s1 + $0x238] sm:$0xff]  }
  0xd5   : > { %4570 = vmatprep.mubr.bf16.mxu1 %v6159_v55  ;;  %4599 = vmatpush3.bf16.msra.mxu1 %v5310_v54  ;;  %v6949_v54 = vld [vmem:[#allocation21_spill] sm:$0xff] }
  0xd6   : > { %4600 = vmatprep.subr.bf16.mxu1 %v5312_v24  ;;  %4790 = vmatprep.subr.bf16.mxu0 %v5309_v32 }
  0xd7   : > { %4759 = vmatmul.mubr.bf16.gmra.mrb[8].mxu0 %v6149_v51 }
  0xd8   : > { %4762 = vmatprep.mubr.bf16.mxu0 %v6165_v53  ;;  %4791 = vmatpush3.bf16.msra.mxu0 %v5309_v32  ;;  %v2824_v32 = vshll.u32 %v6434_v5, 16 }
  0xd9   : > { %4601 = vmatpush3.bf16.msra.mxu1 %v5312_v24  ;;  %4792 = vmatprep.subr.bf16.mxu0 %v5311_v16  ;;  %v6950_v24 = vld [vmem:[#allocation26_spill] sm:$0xff] }
  0xda   : > { %4602 = vmatprep.subr.bf16.mxu1 %v5314_v37 }
  0xdc   : > { %4571 = vmatmul.mubr.bf16.gmra.mrb[12].mxu1 %v6188_v7  ;;  %4793 = vmatpush3.bf16.msra.mxu0 %v5311_v16  ;;  %v2834_v16 = vshrl.u32 %v6437_v62, 16 }
  0xdd   : > { %4574 = vmatprep.mubr.bf16.mxu1 %v6195_v3  ;;  %4603 = vmatpush3.bf16.msra.mxu1 %v5314_v37  ;;  %v6952_v37 = vld [vmem:[#allocation33_spill] sm:$0xff] }
  0xde   : > { %4604 = vmatprep.subr.bf16.mxu1 %v5318_v1  ;;  %4794 = vmatprep.subr.bf16.mxu0 %v5313_v22 }
  0xdf   : > { %4763 = vmatmul.mubr.bf16.gmra.mrb[12].mxu0 %v6182_v44 }
  0xe0   : > { %4766 = vmatprep.mubr.bf16.mxu0 %v6201_v26  ;;  %4795 = vmatpush3.bf16.msra.mxu0 %v5313_v22  ;;  %v2826_v22 = vrot.slane %v2824_v32, 5 }
  0xe1   : > { %4605 = vmatpush3.bf16.msra.mxu1 %v5318_v1  ;;  %4796 = vmatprep.subr.bf16.mxu0 %v5317_v15  ;;  %v2830_v1 = vshll.u32 %v6437_v62, 16 }
  0xe2   : > { %4878 = vmatprep.subr.bf16.mxu1 %v5320_v11 }
  0xe4   : > { %4575 = vmatmul.mubr.bf16.gmra.mrb[16].mxu1 %v6212_v36  ;;  %4797 = vmatpush3.bf16.msra.mxu0 %v5317_v15  ;;  %v2836_v15 = vrot.slane %v2834_v16, 4 }
  0xe5   : > { %4578 = vmatprep.mubr.bf16.mxu1 %v6236_v19  ;;  %4830 = vmatprep.subr.bf16.mxu0 %v5319_v45 }
  0xe7   : > { %4767 = vmatmul.mubr.bf16.gmra.mrb[16].mxu0 %v6218_v60 }
  0xe8   : > { %4770 = vmatprep.mubr.bf16.mxu0 %v6232_v48 }
  0xec   : > { %4579 = vmatmul.mubr.bf16.gmra.mrb[20].mxu1 %v6246_v30 }
  0xed   : > { %4582 = vmatprep.mubr.bf16.mxu1 %v6263_v39 }
  0xef   : > { %4771 = vmatmul.mubr.bf16.gmra.mrb[20].mxu0 %v6252_v52 }
  0xf0   : > { %4774 = vmatprep.mubr.bf16.mxu0 %v6269_v14 }
  0xf4   : > { %4583 = vmatmul.mubr.bf16.gmra.mrb[24].mxu1 %v6287_v33 }
  0xf5   : > { %4586 = vmatprep.mubr.bf16.mxu1 %v6296_v21 }
  0xf7   : > { %4775 = vmatmul.mubr.bf16.gmra.mrb[24].mxu0 %v6284_v38 }
  0xf8   : > { %4778 = vmatprep.mubr.bf16.mxu0 %v6305_v47 }
  0xfc   : > { %4587 = vmatmul.mubr.bf16.gmra.mrb[28].mxu1 %v6308_v50 }
  0xfd   : > { %4606 = vmatprep.mubr.bf16.mxu1 %v6050_v31  ;;  %v5324_v31 = vld [vmem:[%s6851_s2 + $0x10] sm:$0xff]  }
  0xff   : > { %4779 = vmatmul.mubr.bf16.gmra.mrb[28].mxu0 %v4158_v29 }
 0x100   : > { %4798 = vmatprep.mubr.bf16.mxu0 %v6942_v59 }
 0x104   : > { %4607 = vmatmul.mubr.bf16.vlgmr.msra.gmra.mrb[0].mxu1 %v6060_v12  ;;  %v5326_v12 = vld [vmem:[%s6851_s2 + $0x18] sm:$0xff]  }
 0x105   : > { %4879 = vmatpush3.bf16.msra.mxu1 %v5320_v11  ;;  %4610 = vmatprep.mubr.bf16.mxu1 %v6090_v41  ;;  %v5323_v41 = vld [vmem:[%s6850_s1 + $0x210] sm:$0xff]  }
 0x106   : > { %4880 = vmatprep.subr.bf16.mxu1 %v5322_v9  ;;  %v290_v11 = vld [vmem:[%s5560_s11 + $0xd4] sm:$0x1]  ;;  %s3889_s11 = sand.u32 1, %s5521_s22  }
 0x107   : > { %4799 = vmatmul.mubr.bf16.vlgmr.msra.gmra.mrb[0].mxu0 %v6943_v46  ;;  %s6724_s14 = scalar_lea.sflag [#allocation5], %s3889_s11 }
 0x108   : > { %4831 = vmatpush3.bf16.msra.mxu0 %v5319_v45  ;;  %4802 = vmatprep.mubr.bf16.mxu0 %v6944_v28 }
 0x109   : > { %4881 = vmatpush3.bf16.msra.mxu1 %v5322_v9  ;;  %4832 = vmatprep.subr.bf16.mxu0 %v5321_v0  ;;  %v2840_v9 = vshll.u32 %v290_v11, 16 }
 0x10a   : > { %4882 = vmatprep.subr.bf16.mxu1 %v5324_v31 }
 0x10c   : > { %4611 = vmatmul.mubr.bf16.gmra.mrb[4].mxu1 %v6107_v63  ;;  %4833 = vmatpush3.bf16.msra.mxu0 %v5321_v0  ;;  %v5330_v63 = vld [vmem:[%s6851_s2 + $0x28] sm:$0xff]  }
 0x10d   : > { %4614 = vmatprep.mubr.bf16.mxu1 %v6117_v25  ;;  %4883 = vmatpush3.bf16.msra.mxu1 %v5324_v31  ;;  %v5327_v25 = vld [vmem:[%s6850_s1 + $0x220] sm:$0xff]   ;;  %v2842_v31 = vrot.slane %v2840_v9, 5 }
 0x10e   : > { %4884 = vmatprep.subr.bf16.mxu1 %v5326_v12  ;;  %4834 = vmatprep.subr.bf16.mxu0 %v5323_v41 }
 0x10f   : > { %4803 = vmatmul.mubr.bf16.gmra.mrb[4].mxu0 %v6945_v57 }
 0x110   : > { %4806 = vmatprep.mubr.bf16.mxu0 %v6946_v10  ;;  %4835 = vmatpush3.bf16.msra.mxu0 %v5323_v41 }
 0x111   : > { %4885 = vmatpush3.bf16.msra.mxu1 %v5326_v12  ;;  %4836 = vmatprep.subr.bf16.mxu0 %v5325_v34 }
 0x112   : > { %4886 = vmatprep.subr.bf16.mxu1 %v5328_v4 }
 0x114   : > { %4615 = vmatmul.mubr.bf16.gmra.mrb[8].mxu1 %v6129_v61  ;;  %4837 = vmatpush3.bf16.msra.mxu0 %v5325_v34  ;;  %v5334_v61 = vld [vmem:[%s6851_s2 + $0x38] sm:$0xff]  }
 0x115   : > { %4618 = vmatprep.mubr.bf16.mxu1 %v6149_v51  ;;  %4887 = vmatpush3.bf16.msra.mxu1 %v5328_v4  ;;  %v5331_v51 = vld [vmem:[%s6850_s1 + $0x230] sm:$0xff]  }
 0x116   : > { %4888 = vmatprep.subr.bf16.mxu1 %v5330_v63  ;;  %4838 = vmatprep.subr.bf16.mxu0 %v5327_v25  ;;  %v6953_v34 = vld [vmem:[#allocation10_spill] sm:$0xff] }
 0x117   : > { %4807 = vmatmul.mubr.bf16.gmra.mrb[8].mxu0 %v6947_v58 }
 0x118   : > { %4810 = vmatprep.mubr.bf16.mxu0 %v6948_v49  ;;  %4839 = vmatpush3.bf16.msra.mxu0 %v5327_v25 }
 0x119   : > { %4889 = vmatpush3.bf16.msra.mxu1 %v5330_v63  ;;  %4840 = vmatprep.subr.bf16.mxu0 %v5329_v42 }
 0x11a   : > { %4890 = vmatprep.subr.bf16.mxu1 %v5332_v18 }
 0x11c   : > { %4619 = vmatmul.mubr.bf16.gmra.mrb[12].mxu1 %v6165_v53  ;;  %4841 = vmatpush3.bf16.msra.mxu0 %v5329_v42  ;;  %v6951_v53 = vld [vmem:[#allocation30_spill] sm:$0xff] }
 0x11d   : > { %4622 = vmatprep.mubr.bf16.mxu1 %v6182_v44  ;;  %4891 = vmatpush3.bf16.msra.mxu1 %v5332_v18  ;;  %v2821_v44 = vshrl.u32 %v6434_v5, 16 }
 0x11e   : > { %4892 = vmatprep.subr.bf16.mxu1 %v5334_v61  ;;  %4842 = vmatprep.subr.bf16.mxu0 %v5331_v51 }
 0x11f   : > { %4811 = vmatmul.mubr.bf16.gmra.mrb[12].mxu0 %v6949_v54 }
 0x120   : > { %4814 = vmatprep.mubr.bf16.mxu0 %v6950_v24  ;;  %4843 = vmatpush3.bf16.msra.mxu0 %v5331_v51 }
 0x121   : > { %4893 = vmatpush3.bf16.msra.mxu1 %v5334_v61  ;;  %4844 = vmatprep.subr.bf16.mxu0 %v5333_v23 }
 0x124   : > { %4623 = vmatmul.mubr.bf16.gmra.mrb[16].mxu1 %v6201_v26  ;;  %4845 = vmatpush3.bf16.msra.mxu0 %v5333_v23  ;;  %v2823_v26 = vrot.slane %v2821_v44, 4 }
 0x125   : > { %4626 = vmatprep.mubr.bf16.mxu1 %v6218_v60  ;;  %v2832_v60 = vrot.slane %v2830_v1, 5 }
 0x126   : > { %v2827_v45 = vor.u32 %v2826_v22, %v2823_v26 }
 0x127   : > { %4815 = vmatmul.mubr.bf16.gmra.mrb[16].mxu0 %v6951_v53  ;;  %v2837_v29 = vor.u32 %v2836_v15, %v2832_v60 }
 0x128   : > { %4818 = vmatprep.mubr.bf16.mxu0 %v6952_v37  ;;  %v2828_v0 = vrot.slane %v2827_v45, 4 }
 0x12c   : > { %4627 = vmatmul.mubr.bf16.gmra.mrb[20].mxu1 %v6232_v48  ;;  %v2838_v48 = vrot.slane %v2837_v29, 4 }
 0x12d   : > { %4630 = vmatprep.mubr.bf16.mxu1 %v6252_v52  ;;  %v2833_v52 = vsel %vm5646_vm2, %v2828_v0, %v2832_v60 }
 0x12e   : > { %v2843_v12 = vsel %vm5646_vm2, %v2838_v48, %v2842_v31 }
 0x12f   : > { %4819 = vmatmul.mubr.bf16.gmra.mrb[20].mxu0 %v6014_v20  ;;  %v4167_v41 = vcombine.low %v2833_v52, %v2843_v12 }
 0x130   : > { %4822 = vmatprep.mubr.bf16.mxu0 %v6030_v2 }
 0x134   : > { %4631 = vmatmul.mubr.bf16.gmra.mrb[24].mxu1 %v6269_v14 }
 0x135   : > { %4634 = vmatprep.mubr.bf16.mxu1 %v6284_v38 }
 0x137   : > { %4823 = vmatmul.mubr.bf16.gmra.mrb[24].mxu0 %v6052_v35 }
 0x138   : > { %4826 = vmatprep.mubr.bf16.mxu0 %v6082_v13 }
 0x13c   : > { %4635 = vmatmul.mubr.bf16.gmra.mrb[28].mxu1 %v6305_v47 }
 0x13d   : > { %4894 = vmatprep.mubr.bf16.mxu1 %v6953_v34 }
 0x13f   : > { %4827 = vmatmul.mubr.bf16.gmra.mrb[28].mxu0 %v4167_v41 }
 0x140   : > { %4846 = vmatprep.mubr.bf16.mxu0 %v6093_v17  ;;  %v4176_v17 = vrot.slane %v6434_v5, 9 }
 0x144   : > { %4895 = vmatmul.mubr.bf16.vlgmr.msra.gmra.mrb[32].mxu1 %v6942_v59 }
 0x145   : > { %4898 = vmatprep.mubr.bf16.mxu1 %v6943_v46 }
 0x147   : > { %4847 = vmatmul.mubr.bf16.vlgmr.msra.gmra.mrb[0].mxu0 %v6103_v43  ;;  %v3110_v43 = vrot.slane %v3108_v40, 4 }
 0x148   : > { %4850 = vmatprep.mubr.bf16.mxu0 %v6134_v56  ;;  %v3111_v56 = vrot.slane %v290_v11, 5 }
 0x14c   : > { %4899 = vmatmul.mubr.bf16.gmra.mrb[36].mxu1 %v6944_v28 }
 0x14d   : > { %4902 = vmatprep.mubr.bf16.mxu1 %v6945_v57 }
 0x14f   : > { %4851 = vmatmul.mubr.bf16.gmra.mrb[4].mxu0 %v6143_v6  ;;  %v3112_v6 = vsel %vm6037_vm5, %v3110_v43, %v3111_v56 }
 0x150   : > { %4854 = vmatprep.mubr.bf16.mxu0 %v6159_v55 }
 0x154   : > { %4903 = vmatmul.mubr.bf16.gmra.mrb[40].mxu1 %v6946_v10 }
 0x155   : > { %4906 = vmatprep.mubr.bf16.mxu1 %v6947_v58 }
 0x157   : > { %4855 = vmatmul.mubr.bf16.gmra.mrb[8].mxu0 %v6188_v7 }
 0x158   : > { %4858 = vmatprep.mubr.bf16.mxu0 %v6195_v3 }
 0x15c   : > { %4907 = vmatmul.mubr.bf16.gmra.mrb[44].mxu1 %v6948_v49 }
 0x15d   : > { %4910 = vmatprep.mubr.bf16.mxu1 %v6949_v54 }
 0x15f   : > { %4859 = vmatmul.mubr.bf16.gmra.mrb[12].mxu0 %v6212_v36 }
 0x160   : > { %4862 = vmatprep.mubr.bf16.mxu0 %v6236_v19 }
 0x164   : > { %4911 = vmatmul.mubr.bf16.gmra.mrb[48].mxu1 %v6950_v24 }
 0x165   : > { %4914 = vmatprep.mubr.bf16.mxu1 %v6951_v53 }
 0x167   : > { %4863 = vmatmul.mubr.bf16.gmra.mrb[16].mxu0 %v6246_v30 }
 0x168   : > { %4866 = vmatprep.mubr.bf16.mxu0 %v6263_v39 }
 0x16c   : > { %4915 = vmatmul.mubr.bf16.gmra.mrb[52].mxu1 %v6952_v37 }
 0x16d   : > { %4918 = vmatprep.mubr.bf16.mxu1 %v6014_v20  ;;  %v3109_v20 = vsel %vm6037_vm5, %v4176_v17, %v3108_v40 }
 0x16e   : > { %v4177_v55 = vcombine.low %v3109_v20, %v3112_v6 }
 0x16f   : > { %4867 = vmatmul.mubr.bf16.gmra.mrb[20].mxu0 %v6287_v33 }
 0x170   : > { %4870 = vmatprep.mubr.bf16.mxu0 %v6296_v21 }
 0x174   : > { %4919 = vmatmul.mubr.bf16.gmra.mrb[56].mxu1 %v6030_v2 }
 0x175   : > { %4922 = vmatprep.mubr.bf16.mxu1 %v6052_v35 }
 0x177   : > { %4871 = vmatmul.mubr.bf16.gmra.mrb[24].mxu0 %v6308_v50 }
 0x178   : > { %4874 = vmatprep.mubr.bf16.mxu0 %v6322_v8 }
 0x17c   : > { %4923 = vmatmul.mubr.bf16.gmra.mrb[60].mxu1 %v6082_v13 }
 0x17f   : > { %4875 = vmatmul.mubr.bf16.gmra.mrb[28].mxu0 %v4177_v55 }
 0x1d7   : > { %v4608_v2 = vpop.f32.mrb[0].mxu1 }
 0x1d8   : > { %v1844_v35 = vpop.f32.mrb[1].mxu1 }
 0x1d9   : > { %v4609_v7 = vpop.f32.mrb[2].mxu1 }
 0x1da   : > { %v1847_v3 = vpop.f32.mrb[3].mxu1 }
 0x1df   : > { %v6561_v36 = vpop.f32.mrb[4].mxu1 }
 0x1e0   : > { %v6563_v19 = vpop.f32.mrb[5].mxu1 }
 0x1e1   : > { %v6565_v30 = vpop.f32.mrb[6].mxu1 }
 0x1e2   : > { %v6567_v39 = vpop.f32.mrb[7].mxu1 }
 0x1e7   : > { %v6569_v14 = vpop.f32.mrb[8].mxu1 }
 0x1e8   : > { %v6571_v27 = vpop.f32.mrb[9].mxu1 }
 0x1e9   : > { %v6573_v38 = vpop.f32.mrb[10].mxu1 }
 0x1ea   : > { %v6575_v13 = vpop.f32.mrb[11].mxu1 }
 0x1ef   : > { %v6577_v33 = vpop.f32.mrb[12].mxu1 }
 0x1f0   : > { %v6579_v21 = vpop.f32.mrb[13].mxu1 }
 0x1f1   : > { %v6581_v47 = vpop.f32.mrb[14].mxu1 }
 0x1f2   : > { %v6583_v50 = vpop.f32.mrb[15].mxu1 }
 0x1f7   : > { %v6585_v8 = vpop.f32.mrb[16].mxu1 }
 0x1f8   : > { %v6587_v5 = vpop.f32.mrb[17].mxu1 }
 0x1f9   : > { %v6589_v62 = vpop.f32.mrb[18].mxu1 }
 0x1fa   : > { %v6591_v59 = vpop.f32.mrb[19].mxu1 }
 0x1ff   : > { %v6593_v46 = vpop.f32.mrb[20].mxu1 }
 0x200   : > { %v6595_v28 = vpop.f32.mrb[21].mxu1 }
 0x201   : > { %v6597_v4 = vpop.f32.mrb[22].mxu1 }
 0x202   : > { %v6599_v57 = vpop.f32.mrb[23].mxu1 }
 0x207   : > { %v6601_v10 = vpop.f32.mrb[24].mxu1 }
 0x208   : > { %v6603_v63 = vpop.f32.mrb[25].mxu1 }
 0x209   : > { %v6605_v25 = vpop.f32.mrb[26].mxu1 }
 0x20a   : > { %v6607_v42 = vpop.f32.mrb[27].mxu1 }
 0x20f   : > { %v6609_v18 = vpop.f32.mrb[28].mxu1 }
 0x210   : > { %v6611_v58 = vpop.f32.mrb[29].mxu1 }
 0x211   : > { %v6613_v49 = vpop.f32.mrb[30].mxu1 }
 0x212   : > { %v6615_v61 = vpop.f32.mrb[31].mxu1 }
 0x217   : > { %v4896_v51 = vpop.f32.mrb[32].mxu1 }
 0x218   : > { %3633 = vst [vmem:[%s5564_s13 + $0x10] sm:$0xff] %v4896_v51  ;;  %v3472_v23 = vpop.f32.mrb[33].mxu1  ;;  %v3809_v44 = vmul.f32 %v4896_v51, %v4896_v51 }
 0x219   : > { %3631 = vst [vmem:[%s5564_s13] sm:$0xff] %v3472_v23  ;;  %v3807_v54 = vmul.f32 %v3472_v23, %v3472_v23  ;;  %v4897_v24 = vpop.f32.mrb[34].mxu1 }
 0x21a   : > { %3634 = vst [vmem:[%s5564_s13 + $0x18] sm:$0xff] %v4897_v24  ;;  %v3475_v53 = vpop.f32.mrb[35].mxu1  ;;  %v4848_v37 = vpop.f32.mrb[0].mxu0  ;;  %v3810_v29 = vmul.f32 %v4897_v24, %v4897_v24 }
 0x21b   : > { %3632 = vst [vmem:[%s5564_s13 + $0x8] sm:$0xff] %v3475_v53  ;;  %v3770_v32 = vadd.f32 %v3475_v53, %v3472_v23  ;;  %v3808_v16 = vmul.f32 %v3475_v53, %v3475_v53  ;;  %v4926_v1 = vadd.f32 %v4848_v37, %v4608_v2  ;;  %v3215_v26 = vpop.f32.mrb[1].mxu0 }
 0x21c   : > { %v4927_v15 = vadd.f32 %v3215_v26, %v1844_v35  ;;  %v4849_v11 = vpop.f32.mrb[2].mxu0 }
 0x21d   : > { %v3771_v22 = vadd.f32 %v4896_v51, %v3770_v32  ;;  %v3839_v60 = vadd.f32 %v3808_v16, %v3807_v54  ;;  %3601 = vst [vmem:[%s5562_s12 + $0x10] sm:$0xff] %v4926_v1  ;;  %v4928_v45 = vadd.f32 %v4849_v11, %v4609_v7  ;;  %v3218_v9 = vpop.f32.mrb[3].mxu0 }
 0x21e   : > { %3599 = vst [vmem:[%s5562_s12] sm:$0xff] %v4927_v15  ;;  %v4929_v52 = vadd.f32 %v3218_v9, %v1847_v3  ;;  %v3701_v43 = vmul.f32 %v4927_v15, %v4927_v15  ;;  %v3703_v3 = vmul.f32 %v4926_v1, %v4926_v1 }
 0x21f   : > { %v3840_v0 = vadd.f32 %v3839_v60, %v3809_v44  ;;  %v4900_v48 = vpop.f32.mrb[36].mxu1  ;;  %v3772_v31 = vadd.f32 %v4897_v24, %v3771_v22  ;;  %3602 = vst [vmem:[%s5562_s12 + $0x18] sm:$0xff] %v4928_v45  ;;  %v3704_v16 = vmul.f32 %v4928_v45, %v4928_v45 }
 0x220   : > { %3637 = vst [vmem:[%s5564_s13 + $0x30] sm:$0xff] %v4900_v48  ;;  %v3488_v12 = vpop.f32.mrb[37].mxu1  ;;  %3600 = vst [vmem:[%s5562_s12 + $0x8] sm:$0xff] %v4929_v52  ;;  %v3664_v56 = vadd.f32 %v4929_v52, %v4927_v15  ;;  %v3702_v20 = vmul.f32 %v4929_v52, %v4929_v52  ;;  %v3813_v55 = vmul.f32 %v4900_v48, %v4900_v48 }
 0x221   : > { %3635 = vst [vmem:[%s5564_s13 + $0x20] sm:$0xff] %v3488_v12  ;;  %v3773_v41 = vadd.f32 %v3772_v31, %v3488_v12  ;;  %v3811_v34 = vmul.f32 %v3488_v12, %v3488_v12  ;;  %v3841_v40 = vadd.f32 %v3840_v0, %v3810_v29  ;;  %v4901_v17 = vpop.f32.mrb[38].mxu1 }
 0x222   : > { %3638 = vst [vmem:[%s5564_s13 + $0x38] sm:$0xff] %v4901_v17  ;;  %v3491_v6 = vpop.f32.mrb[39].mxu1  ;;  %v3665_v51 = vadd.f32 %v4926_v1, %v3664_v56  ;;  %v3733_v23 = vadd.f32 %v3702_v20, %v3701_v43  ;;  %v4852_v54 = vpop.f32.mrb[4].mxu0  ;;  %v3814_v15 = vmul.f32 %v4901_v17, %v4901_v17 }
 0x223   : > { %v3842_v2 = vadd.f32 %v3841_v40, %v3811_v34  ;;  %3636 = vst [vmem:[%s5564_s13 + $0x28] sm:$0xff] %v3491_v6  ;;  %v3774_v35 = vadd.f32 %v3773_v41, %v3491_v6  ;;  %v3812_v7 = vmul.f32 %v3491_v6, %v3491_v6  ;;  %v4930_v24 = vadd.f32 %v4852_v54, %v6561_v36  ;;  %v3231_v53 = vpop.f32.mrb[5].mxu0 }
 0x224   : > { %v3734_v37 = vadd.f32 %v3733_v23, %v3703_v3  ;;  %v4931_v26 = vadd.f32 %v3231_v53, %v6563_v19  ;;  %v3666_v22 = vadd.f32 %v4928_v45, %v3665_v51  ;;  %v4853_v60 = vpop.f32.mrb[6].mxu0 }
 0x225   : > { %v3775_v44 = vadd.f32 %v4900_v48, %v3774_v35  ;;  %v3843_v32 = vadd.f32 %v3842_v2, %v3812_v7  ;;  %3605 = vst [vmem:[%s5562_s12 + $0x30] sm:$0xff] %v4930_v24  ;;  %v4932_v1 = vadd.f32 %v4853_v60, %v6565_v30  ;;  %v3234_v11 = vpop.f32.mrb[7].mxu0  ;;  %v3707_v6 = vmul.f32 %v4930_v24, %v4930_v24 }
 0x226   : > { %3603 = vst [vmem:[%s5562_s12 + $0x20] sm:$0xff] %v4931_v26  ;;  %v3667_v0 = vadd.f32 %v4931_v26, %v3666_v22  ;;  %v3705_v48 = vmul.f32 %v4931_v26, %v4931_v26  ;;  %v3735_v31 = vadd.f32 %v3734_v37, %v3704_v16  ;;  %v4933_v19 = vadd.f32 %v3234_v11, %v6567_v39 }
 0x227   : > { %v3844_v29 = vadd.f32 %v3843_v32, %v3813_v55  ;;  %v4904_v36 = vpop.f32.mrb[40].mxu1  ;;  %v3776_v9 = vadd.f32 %v4901_v17, %v3775_v44  ;;  %3606 = vst [vmem:[%s5562_s12 + $0x38] sm:$0xff] %v4932_v1  ;;  %v3708_v7 = vmul.f32 %v4932_v1, %v4932_v1 }
 0x228   : > { %3641 = vst [vmem:[%s5564_s13 + $0x50] sm:$0xff] %v4904_v36  ;;  %v3504_v45 = vpop.f32.mrb[41].mxu1  ;;  %v3736_v41 = vadd.f32 %v3735_v31, %v3705_v48  ;;  %3604 = vst [vmem:[%s5562_s12 + $0x28] sm:$0xff] %v4933_v19  ;;  %v3668_v34 = vadd.f32 %v4933_v19, %v3667_v0  ;;  %v3706_v40 = vmul.f32 %v4933_v19, %v4933_v19 }
 0x229   : > { %3639 = vst [vmem:[%s5564_s13 + $0x40] sm:$0xff] %v3504_v45  ;;  %v3777_v52 = vadd.f32 %v3776_v9, %v3504_v45  ;;  %v3815_v30 = vmul.f32 %v3504_v45, %v3504_v45  ;;  %v4905_v12 = vpop.f32.mrb[42].mxu1  ;;  %v3845_v17 = vadd.f32 %v3844_v29, %v3814_v15  ;;  %v3817_v51 = vmul.f32 %v4904_v36, %v4904_v36 }
 0x22a   : > { %3642 = vst [vmem:[%s5564_s13 + $0x58] sm:$0xff] %v4905_v12  ;;  %v3507_v43 = vpop.f32.mrb[43].mxu1  ;;  %v3669_v39 = vadd.f32 %v4930_v24, %v3668_v34  ;;  %v3737_v55 = vadd.f32 %v3736_v41, %v3706_v40  ;;  %v4856_v2 = vpop.f32.mrb[8].mxu0 }
 0x22b   : > { %3640 = vst [vmem:[%s5564_s13 + $0x48] sm:$0xff] %v3507_v43  ;;  %v3778_v56 = vadd.f32 %v3777_v52, %v3507_v43  ;;  %v3816_v20 = vmul.f32 %v3507_v43, %v3507_v43  ;;  %v3846_v35 = vadd.f32 %v3845_v17, %v3815_v30  ;;  %v4934_v3 = vadd.f32 %v4856_v2, %v6569_v14  ;;  %v3247_v23 = vpop.f32.mrb[9].mxu0 }
 0x22c   : > { %v3738_v53 = vadd.f32 %v3737_v55, %v3707_v6  ;;  %v4935_v44 = vadd.f32 %v3247_v23, %v6571_v27  ;;  %v3670_v32 = vadd.f32 %v4932_v1, %v3669_v39  ;;  %v4857_v16 = vpop.f32.mrb[10].mxu0  ;;  %v3818_v1 = vmul.f32 %v4905_v12, %v4905_v12 }
 0x22d   : > { %v3779_v54 = vadd.f32 %v4904_v36, %v3778_v56  ;;  %v3847_v37 = vadd.f32 %v3846_v35, %v3816_v20  ;;  %3609 = vst [vmem:[%s5562_s12 + $0x50] sm:$0xff] %v4934_v3  ;;  %v4936_v24 = vadd.f32 %v4857_v16, %v6573_v38  ;;  %v3250_v26 = vpop.f32.mrb[11].mxu0  ;;  %v3711_v41 = vmul.f32 %v4934_v3, %v4934_v3 }
 0x22e   : > { %3607 = vst [vmem:[%s5562_s12 + $0x40] sm:$0xff] %v4935_v44  ;;  %v3671_v14 = vadd.f32 %v4935_v44, %v3670_v32  ;;  %v3709_v15 = vmul.f32 %v4935_v44, %v4935_v44  ;;  %v3739_v11 = vadd.f32 %v3738_v53, %v3708_v7  ;;  %v4937_v29 = vadd.f32 %v3250_v26, %v6575_v13 }
 0x22f   : > { %v4908_v22 = vpop.f32.mrb[44].mxu1  ;;  %v3780_v60 = vadd.f32 %v4905_v12, %v3779_v54  ;;  %3610 = vst [vmem:[%s5562_s12 + $0x58] sm:$0xff] %v4936_v24  ;;  %v3848_v36 = vadd.f32 %v3847_v37, %v3817_v51  ;;  %v3712_v39 = vmul.f32 %v4936_v24, %v4936_v24 }
 0x230   : > { %3645 = vst [vmem:[%s5564_s13 + $0x70] sm:$0xff] %v4908_v22  ;;  %v3520_v27 = vpop.f32.mrb[45].mxu1  ;;  %v3740_v0 = vadd.f32 %v3739_v11, %v3709_v15  ;;  %3608 = vst [vmem:[%s5562_s12 + $0x48] sm:$0xff] %v4937_v29  ;;  %v3672_v48 = vadd.f32 %v4937_v29, %v3671_v14  ;;  %v3710_v31 = vmul.f32 %v4937_v29, %v4937_v29 }
 0x231   : > { %3643 = vst [vmem:[%s5564_s13 + $0x60] sm:$0xff] %v3520_v27  ;;  %v3781_v9 = vadd.f32 %v3780_v60, %v3520_v27  ;;  %v4909_v38 = vpop.f32.mrb[46].mxu1  ;;  %v3819_v19 = vmul.f32 %v3520_v27, %v3520_v27  ;;  %v3849_v52 = vadd.f32 %v3848_v36, %v3818_v1  ;;  %v3821_v43 = vmul.f32 %v4908_v22, %v4908_v22 }
 0x232   : > { %3646 = vst [vmem:[%s5564_s13 + $0x78] sm:$0xff] %v4909_v38  ;;  %v3523_v45 = vpop.f32.mrb[47].mxu1  ;;  %v3673_v34 = vadd.f32 %v4934_v3, %v3672_v48  ;;  %v3741_v40 = vadd.f32 %v3740_v0, %v3710_v31  ;;  %v4860_v12 = vpop.f32.mrb[12].mxu0  ;;  %v3822_v37 = vmul.f32 %v4909_v38, %v4909_v38 }
 0x233   : > { %3644 = vst [vmem:[%s5564_s13 + $0x68] sm:$0xff] %v3523_v45  ;;  %v3782_v30 = vadd.f32 %v3781_v9, %v3523_v45  ;;  %v3820_v13 = vmul.f32 %v3523_v45, %v3523_v45  ;;  %v4938_v17 = vadd.f32 %v4860_v12, %v6577_v33  ;;  %v3263_v56 = vpop.f32.mrb[13].mxu0  ;;  %v3850_v20 = vadd.f32 %v3849_v52, %v3819_v19 }
 0x234   : > { %v3742_v55 = vadd.f32 %v3741_v40, %v3711_v41  ;;  %v4939_v2 = vadd.f32 %v3263_v56, %v6579_v21  ;;  %v3674_v35 = vadd.f32 %v4936_v24, %v3673_v34  ;;  %v4861_v7 = vpop.f32.mrb[14].mxu0 }
 0x235   : > { %v3783_v6 = vadd.f32 %v4908_v22, %v3782_v30  ;;  %3613 = vst [vmem:[%s5562_s12 + $0x70] sm:$0xff] %v4938_v17  ;;  %v4940_v3 = vadd.f32 %v4861_v7, %v6581_v47  ;;  %v3266_v51 = vpop.f32.mrb[15].mxu0  ;;  %v3851_v23 = vadd.f32 %v3850_v20, %v3820_v13  ;;  %v3715_v1 = vmul.f32 %v4938_v17, %v4938_v17 }
 0x236   : > { %3611 = vst [vmem:[%s5562_s12 + $0x60] sm:$0xff] %v4939_v2  ;;  %v3675_v53 = vadd.f32 %v4939_v2, %v3674_v35  ;;  %v3713_v44 = vmul.f32 %v4939_v2, %v4939_v2  ;;  %v3743_v32 = vadd.f32 %v3742_v55, %v3712_v39  ;;  %v4941_v16 = vadd.f32 %v3266_v51, %v6583_v50 }
 0x237   : > { %v4912_v33 = vpop.f32.mrb[48].mxu1  ;;  %v3784_v54 = vadd.f32 %v4909_v38, %v3783_v6  ;;  %3614 = vst [vmem:[%s5562_s12 + $0x78] sm:$0xff] %v4940_v3  ;;  %v3852_v24 = vadd.f32 %v3851_v23, %v3821_v43  ;;  %v3716_v52 = vmul.f32 %v4940_v3, %v4940_v3 }
 0x238   : > { %3649 = vst [vmem:[%s5564_s13 + $0x90] sm:$0xff] %v4912_v33  ;;  %v3536_v21 = vpop.f32.mrb[49].mxu1  ;;  %v3744_v22 = vadd.f32 %v3743_v32, %v3713_v44  ;;  %3612 = vst [vmem:[%s5562_s12 + $0x68] sm:$0xff] %v4941_v16  ;;  %v3676_v60 = vadd.f32 %v4941_v16, %v3675_v53  ;;  %v3714_v14 = vmul.f32 %v4941_v16, %v4941_v16 }
 0x239   : > { %3647 = vst [vmem:[%s5564_s13 + $0x80] sm:$0xff] %v3536_v21  ;;  %v3785_v47 = vadd.f32 %v3784_v54, %v3536_v21  ;;  %v4913_v26 = vpop.f32.mrb[50].mxu1  ;;  %v3823_v15 = vmul.f32 %v3536_v21, %v3536_v21  ;;  %v3853_v29 = vadd.f32 %v3852_v24, %v3822_v37  ;;  %v3825_v48 = vmul.f32 %v4912_v33, %v4912_v33 }
 0x23a   : > { %3650 = vst [vmem:[%s5564_s13 + $0x98] sm:$0xff] %v4913_v26  ;;  %v3539_v11 = vpop.f32.mrb[51].mxu1  ;;  %v3677_v36 = vadd.f32 %v4938_v17, %v3676_v60  ;;  %v3745_v9 = vadd.f32 %v3744_v22, %v3714_v14  ;;  %v4864_v38 = vpop.f32.mrb[16].mxu0  ;;  %v3826_v55 = vmul.f32 %v4913_v26, %v4913_v26 }
 0x23b   : > { %3648 = vst [vmem:[%s5564_s13 + $0x88] sm:$0xff] %v3539_v11  ;;  %v3786_v27 = vadd.f32 %v3785_v47, %v3539_v11  ;;  %v3824_v50 = vmul.f32 %v3539_v11, %v3539_v11  ;;  %v4942_v0 = vadd.f32 %v4864_v38, %v6585_v8  ;;  %v3279_v31 = vpop.f32.mrb[17].mxu0  ;;  %v3854_v19 = vadd.f32 %v3853_v29, %v3823_v15 }
 0x23c   : > { %v3746_v30 = vadd.f32 %v3745_v9, %v3715_v1  ;;  %v4943_v13 = vadd.f32 %v3279_v31, %v6587_v5  ;;  %v3678_v41 = vadd.f32 %v4940_v3, %v3677_v36  ;;  %v4865_v34 = vpop.f32.mrb[18].mxu0 }
 0x23d   : > { %v3787_v45 = vadd.f32 %v4912_v33, %v3786_v27  ;;  %3617 = vst [vmem:[%s5562_s12 + $0x90] sm:$0xff] %v4942_v0  ;;  %v4944_v40 = vadd.f32 %v4865_v34, %v6589_v62  ;;  %v3282_v12 = vpop.f32.mrb[19].mxu0  ;;  %v3855_v17 = vadd.f32 %v3854_v19, %v3824_v50  ;;  %v3719_v44 = vmul.f32 %v4942_v0, %v4942_v0 }
 0x23e   : > { %3615 = vst [vmem:[%s5562_s12 + $0x80] sm:$0xff] %v4943_v13  ;;  %v3679_v56 = vadd.f32 %v4943_v13, %v3678_v41  ;;  %v3717_v20 = vmul.f32 %v4943_v13, %v4943_v13  ;;  %v3747_v6 = vadd.f32 %v3746_v30, %v3716_v52  ;;  %v4945_v39 = vadd.f32 %v3282_v12, %v6591_v59 }
 0x23f   : > { %v4916_v8 = vpop.f32.mrb[52].mxu1  ;;  %v3788_v43 = vadd.f32 %v4913_v26, %v3787_v45  ;;  %3618 = vst [vmem:[%s5562_s12 + $0x98] sm:$0xff] %v4944_v40  ;;  %v3856_v2 = vadd.f32 %v3855_v17, %v3825_v48  ;;  %v3720_v60 = vmul.f32 %v4944_v40, %v4944_v40 }
 0x240   : > { %3653 = vst [vmem:[%s5564_s13 + $0xb0] sm:$0xff] %v4916_v8  ;;  %v3552_v5 = vpop.f32.mrb[53].mxu1  ;;  %v3748_v7 = vadd.f32 %v3747_v6, %v3717_v20  ;;  %3616 = vst [vmem:[%s5562_s12 + $0x88] sm:$0xff] %v4945_v39  ;;  %v3680_v3 = vadd.f32 %v4945_v39, %v3679_v56  ;;  %v3718_v51 = vmul.f32 %v4945_v39, %v4945_v39 }
 0x241   : > { %3651 = vst [vmem:[%s5564_s13 + $0xa0] sm:$0xff] %v3552_v5  ;;  %v3789_v62 = vadd.f32 %v3788_v43, %v3552_v5  ;;  %v4917_v35 = vpop.f32.mrb[54].mxu1  ;;  %v3827_v23 = vmul.f32 %v3552_v5, %v3552_v5  ;;  %v3857_v54 = vadd.f32 %v3856_v2, %v3826_v55  ;;  %v3829_v24 = vmul.f32 %v4916_v8, %v4916_v8 }
 0x242   : > { %3654 = vst [vmem:[%s5564_s13 + $0xb8] sm:$0xff] %v4917_v35  ;;  %v3555_v33 = vpop.f32.mrb[55].mxu1  ;;  %v3681_v32 = vadd.f32 %v4942_v0, %v3680_v3  ;;  %v3749_v16 = vadd.f32 %v3748_v7, %v3718_v51  ;;  %v4868_v21 = vpop.f32.mrb[20].mxu0  ;;  %v3830_v31 = vmul.f32 %v4917_v35, %v4917_v35 }
 0x243   : > { %3652 = vst [vmem:[%s5564_s13 + $0xa8] sm:$0xff] %v3555_v33  ;;  %v3790_v53 = vadd.f32 %v3789_v62, %v3555_v33  ;;  %v3828_v59 = vmul.f32 %v3555_v33, %v3555_v33  ;;  %v4946_v37 = vadd.f32 %v4868_v21, %v6593_v46  ;;  %v3295_v47 = vpop.f32.mrb[21].mxu0  ;;  %v3858_v26 = vadd.f32 %v3857_v54, %v3827_v23 }
 0x244   : > { %v3750_v14 = vadd.f32 %v3749_v16, %v3719_v44  ;;  %v4947_v15 = vadd.f32 %v3295_v47, %v6595_v28  ;;  %v3682_v11 = vadd.f32 %v4944_v40, %v3681_v32  ;;  %v4869_v29 = vpop.f32.mrb[22].mxu0 }
 0x245   : > { %v3791_v22 = vadd.f32 %v4916_v8, %v3790_v53  ;;  %3621 = vst [vmem:[%s5562_s12 + $0xb0] sm:$0xff] %v4946_v37  ;;  %v4948_v27 = vadd.f32 %v4869_v29, %v6597_v4  ;;  %v3298_v50 = vpop.f32.mrb[23].mxu0  ;;  %v3859_v1 = vadd.f32 %v3858_v26, %v3828_v59  ;;  %v3723_v17 = vmul.f32 %v4946_v37, %v4946_v37 }
 0x246   : > { %3619 = vst [vmem:[%s5562_s12 + $0xa0] sm:$0xff] %v4947_v15  ;;  %v3683_v9 = vadd.f32 %v4947_v15, %v3682_v11  ;;  %v3721_v38 = vmul.f32 %v4947_v15, %v4947_v15  ;;  %v3751_v0 = vadd.f32 %v3750_v14, %v3720_v60  ;;  %v4949_v48 = vadd.f32 %v3298_v50, %v6599_v57 }
 0x247   : > { %v4920_v46 = vpop.f32.mrb[56].mxu1  ;;  %v3792_v36 = vadd.f32 %v4917_v35, %v3791_v22  ;;  %3622 = vst [vmem:[%s5562_s12 + $0xb8] sm:$0xff] %v4948_v27  ;;  %v3860_v19 = vadd.f32 %v3859_v1, %v3829_v24  ;;  %v3724_v2 = vmul.f32 %v4948_v27, %v4948_v27 }
 0x248   : > { %3657 = vst [vmem:[%s5564_s13 + $0xd0] sm:$0xff] %v4920_v46  ;;  %v3568_v28 = vpop.f32.mrb[57].mxu1  ;;  %v3752_v52 = vadd.f32 %v3751_v0, %v3721_v38  ;;  %3620 = vst [vmem:[%s5562_s12 + $0xa8] sm:$0xff] %v4949_v48  ;;  %v3684_v30 = vadd.f32 %v4949_v48, %v3683_v9  ;;  %v3722_v13 = vmul.f32 %v4949_v48, %v4949_v48 }
 0x249   : > { %3655 = vst [vmem:[%s5564_s13 + $0xc0] sm:$0xff] %v3568_v28  ;;  %v3793_v4 = vadd.f32 %v3792_v36, %v3568_v28  ;;  %v4921_v45 = vpop.f32.mrb[58].mxu1  ;;  %v3831_v41 = vmul.f32 %v3568_v28, %v3568_v28  ;;  %v3861_v40 = vadd.f32 %v3860_v19, %v3830_v31  ;;  %v3833_v6 = vmul.f32 %v4920_v46, %v4920_v46 }
 0x24a   : > { %3658 = vst [vmem:[%s5564_s13 + $0xd8] sm:$0xff] %v4921_v45  ;;  %v3571_v34 = vpop.f32.mrb[59].mxu1  ;;  %v3685_v8 = vadd.f32 %v4946_v37, %v3684_v30  ;;  %v3753_v43 = vadd.f32 %v3752_v52, %v3722_v13  ;;  %v4872_v56 = vpop.f32.mrb[24].mxu0 }
 0x24b   : > { %3656 = vst [vmem:[%s5564_s13 + $0xc8] sm:$0xff] %v3571_v34  ;;  %v3794_v57 = vadd.f32 %v3793_v4, %v3571_v34  ;;  %v3832_v12 = vmul.f32 %v3571_v34, %v3571_v34  ;;  %v4950_v20 = vadd.f32 %v4872_v56, %v6601_v10  ;;  %v3311_v39 = vpop.f32.mrb[25].mxu0  ;;  %v3862_v5 = vadd.f32 %v3861_v40, %v3831_v41 }
 0x24c   : > { %v3754_v62 = vadd.f32 %v3753_v43, %v3723_v17  ;;  %v4951_v35 = vadd.f32 %v3311_v39, %v6603_v63  ;;  %v3686_v7 = vadd.f32 %v4948_v27, %v3685_v8  ;;  %v4873_v3 = vpop.f32.mrb[26].mxu0 }
 0x24d   : > { %v3795_v55 = vadd.f32 %v4920_v46, %v3794_v57  ;;  %3625 = vst [vmem:[%s5562_s12 + $0xd0] sm:$0xff] %v4950_v20  ;;  %v6696_v51 = vadd.f32 %v4873_v3, %v6605_v25  ;;  %v3314_v10 = vpop.f32.mrb[27].mxu0  ;;  %v3863_v23 = vadd.f32 %v3862_v5, %v3832_v12  ;;  %v3834_v25 = vmul.f32 %v4921_v45, %v4921_v45 }
 0x24e   : > { %3623 = vst [vmem:[%s5562_s12 + $0xc0] sm:$0xff] %v4951_v35  ;;  %v3687_v63 = vadd.f32 %v4951_v35, %v3686_v7  ;;  %v3725_v53 = vmul.f32 %v4951_v35, %v4951_v35  ;;  %v3755_v59 = vadd.f32 %v3754_v62, %v3724_v2  ;;  %v4953_v44 = vadd.f32 %v3314_v10, %v6607_v42 }
 0x24f   : > { %v6698_v33 = vpop.f32.mrb[60].mxu1  ;;  %v3796_v54 = vadd.f32 %v4921_v45, %v3795_v55  ;;  %3626 = vst [vmem:[%s5562_s12 + $0xd8] sm:$0xff] %v6696_v51  ;;  %v3864_v16 = vadd.f32 %v3863_v23, %v3833_v6  ;;  %v3727_v11 = vmul.f32 %v4950_v20, %v4950_v20 }
 0x250   : > { %3661 = vst [vmem:[%s5564_s13 + $0xf0] sm:$0xff] %v6698_v33  ;;  %v3584_v32 = vpop.f32.mrb[61].mxu1  ;;  %v3756_v42 = vadd.f32 %v3755_v59, %v3725_v53  ;;  %3624 = vst [vmem:[%s5562_s12 + $0xc8] sm:$0xff] %v4953_v44  ;;  %v3688_v24 = vadd.f32 %v4953_v44, %v3687_v63  ;;  %v3726_v47 = vmul.f32 %v4953_v44, %v4953_v44 }
 0x251   : > { %3659 = vst [vmem:[%s5564_s13 + $0xe0] sm:$0xff] %v3584_v32  ;;  %v3797_v21 = vadd.f32 %v3796_v54, %v3584_v32  ;;  %v6707_v37 = vpop.f32.mrb[62].mxu1  ;;  %v3835_v26 = vmul.f32 %v3584_v32, %v3584_v32  ;;  %v3865_v60 = vadd.f32 %v3864_v16, %v3834_v25 }
 0x252   : > { %3662 = vst [vmem:[%s5564_s13 + $0xf8] sm:$0xff] %v6707_v37  ;;  %v3587_v22 = vpop.f32.mrb[63].mxu1  ;;  %v3689_v29 = vadd.f32 %v4950_v20, %v3688_v24  ;;  %v3757_v27 = vadd.f32 %v3756_v42, %v3726_v47  ;;  %v4876_v50 = vpop.f32.mrb[28].mxu0 }
 0x253   : > { %3660 = vst [vmem:[%s5564_s13 + $0xe8] sm:$0xff] %v3587_v22  ;;  %v3798_v14 = vadd.f32 %v3797_v21, %v3587_v22  ;;  %v3836_v15 = vmul.f32 %v3587_v22, %v3587_v22 }
 0x254   : > { %5351 = shalt.err (!%p5348_p7)
}
 0x255   : > { %s5352_s13 = scalar_lea.hbm %s6714_s10, 4096  ;;  %s5356_s8 = scalar_lea.hbm %s6853_s4, 8192 }
 0x256   : > { %p5353_p8 = scmp.ne.s32.totalorder %s6714_s10, %s5352_s13  ;;  %p5357_p11 = scmp.lt.u32.totalorder %s6714_s10, %s6853_s4 }
 0x257   : > { %p5358_p12 = scmp.lt.u32.totalorder %s5356_s8, %s5352_s13  ;;  %p5360_p0 = scmp.lt.u32.totalorder %s5352_s13, %s6714_s10 }
 0x258   : > { %p5354_p9 = pnand %p5353_p8, %p5542_p5 }
 0x259   : > { %p5359_p13 = por %p5358_p12, %p5357_p11 }
 0x25a   : > { %p5355_p10 = pneg %p5354_p9 }
 0x25b   : > { %p5361_p1 = por %p5360_p0, %p5359_p13 }
 0x25d   : > { %p5362_p3 = pnand %p5361_p1, %p5355_p10 }
 0x25f   : > { %5365 = shalt.err (!%p5362_p3)
}
 0x260   : > { %s5466_s15 = smov 128   ;;  %s5467_s17 = smov 8   ;;  %v4954_v1 = vadd.f32 %v4876_v50, %v6609_v18  ;;  %v3837_v46 = vmul.f32 %v6698_v33, %v6698_v33  ;;  %v3327_v36 = vpop.f32.mrb[29].mxu0  ;;  %v3866_v9 = vadd.f32 %v3865_v60, %v3835_v26  ;;  %v3799_v38 = vadd.f32 %v6698_v33, %v3798_v14 }
 0x261   : > { %5184 = dma.vmem_to_hbm [thread:$0]  (%p5542_p5), %s6716_s7, 4096, %s6714_s10, %s6724_s14, %s5466_s15, %s5466_s15, %s5467_s17   ;;  %v3728_v0 = vmul.f32 %v6696_v51, %v6696_v51  ;;  %v3758_v48 = vadd.f32 %v3757_v27, %v3727_v11  ;;  %v4955_v28 = vadd.f32 %v3327_v36, %v6611_v58  ;;  %v3690_v31 = vadd.f32 %v6696_v51, %v3689_v29  ;;  %v4877_v18 = vpop.f32.mrb[30].mxu0 }
 0x262   : > { %s3903_s25 = sshll.u32 %s5562_s12, 4  ;;  %3629 = vst [vmem:[%s5562_s12 + $0xf0] sm:$0xff] %v4954_v1  ;;  %v4956_v19 = vadd.f32 %v4877_v18, %v6613_v49  ;;  %v3330_v4 = vpop.f32.mrb[31].mxu0  ;;  %v3800_v45 = vadd.f32 %v6707_v37, %v3799_v38  ;;  %v3867_v52 = vadd.f32 %v3866_v9, %v3836_v15  ;;  %s6770_s14 = scalar_lea.hbm %s6852_s3, %s4204_s6  ;;  %v3838_v58 = vmul.f32 %v6707_v37, %v6707_v37  ;;  %s6772_s25 = int_to_ptr.vmem [resolvable:$true] %s3903_s25 }
 0x263   : > { %3627 = vst [vmem:[%s5562_s12 + $0xe0] sm:$0xff] %v4955_v28  ;;  %v3691_v30 = vadd.f32 %v4955_v28, %v3690_v31  ;;  %v3729_v13 = vmul.f32 %v4955_v28, %v4955_v28  ;;  %v3759_v41 = vadd.f32 %v3758_v48, %v3728_v0  ;;  %v4957_v34 = vadd.f32 %v3330_v4, %v6615_v61  ;;  %s6780_s13 = scalar_lea.sflag [#allocation3], %s214_s30  ;;  %s5366_s6 = scalar_lea.vmem %s6772_s25, 4096 }
 0x264   : > { %3630 = vst [vmem:[%s5562_s12 + $0xf8] sm:$0xff] %v4956_v19  ;;  %v3801_v49 = vrot.slane %v3800_v45, 4  ;;  %v3868_v40 = vadd.f32 %v3867_v52, %v3837_v46  ;;  %p5367_p4 = scmp.ne.s32.totalorder %s6772_s25, %s5366_s6  ;;  %s5468_s26 = smov [#allocation2]  }
 0x265   : > { %v3760_v57 = vadd.f32 %v3759_v41, %v3729_v13  ;;  %3628 = vst [vmem:[%s5562_s12 + $0xe8] sm:$0xff] %v4957_v34  ;;  %v3692_v61 = vadd.f32 %v4957_v34, %v3691_v30  ;;  %v3730_v12 = vmul.f32 %v4957_v34, %v4957_v34  ;;  %s5370_s11 = sshll.u32 %s5468_s26, 4  ;;  %s5371_s11 = int_to_ptr.vmem [resolvable:$false] %s5370_s11 }
 0x266   : > { %v3869_v17 = vadd.f32 %v3868_v40, %v3838_v58  ;;  %p5368_p7 = pnand %p5367_p4, %p5542_p5  ;;  %s5372_s8 = scalar_lea.vmem %s5371_s11, 8192 }
 0x267   : > { %p5373_p9 = scmp.lt.s32.totalorder %s6772_s25, %s5371_s11  ;;  %p5374_p10 = scmp.lt.s32.totalorder %s5372_s8, %s5366_s6 }
 0x268   : > { %p5369_p8 = pneg %p5368_p7 }
 0x269   : > { %p5375_p11 = por %p5374_p10, %p5373_p9 }
 0x26b   : > { %p5376_p12 = pnand %p5375_p11, %p5369_p8 }
 0x26d   : > { %5379 = shalt.err (!%p5376_p12)
}
 0x26e   : > { %s5380_s30 = scalar_lea.hbm %s6770_s14, 4096  ;;  %s5384_s16 = scalar_lea.hbm %s6852_s3, 8192 }
 0x26f   : > { %p5381_p13 = scmp.ne.s32.totalorder %s6770_s14, %s5380_s30  ;;  %p5385_p3 = scmp.lt.u32.totalorder %s6770_s14, %s6852_s3 }
 0x270   : > { %p5386_p4 = scmp.lt.u32.totalorder %s5384_s16, %s5380_s30  ;;  %p5388_p8 = scmp.lt.u32.totalorder %s5380_s30, %s6770_s14 }
 0x271   : > { %p5382_p0 = pnand %p5381_p13, %p5542_p5 }
 0x272   : > { %p5387_p7 = por %p5386_p4, %p5385_p3 }
 0x273   : > { %p5383_p1 = pneg %p5382_p0 }
 0x274   : > { %p5389_p9 = por %p5388_p8, %p5387_p7 }
 0x276   : > { %p5390_p10 = pnand %p5389_p9, %p5383_p1 }
 0x278   : > { %5393 = shalt.err (!%p5390_p10)
}
 0x279   : > { %5183 = dma.vmem_to_hbm [thread:$0]  (%p5542_p5), %s6772_s25, 4096, %s6770_s14, %s6780_s13, %s5466_s15, %s5466_s15, %s5467_s17   ;;  %v3731_v8 = vmul.f32 %v4954_v1, %v4954_v1  ;;  %v3693_v43 = vadd.f32 %v4954_v1, %v3692_v61  ;;  %v3761_v56 = vadd.f32 %v3760_v57, %v3730_v12  ;;  %v3802_v20 = vadd.f32 %v3801_v49, %v3800_v45  ;;  %v3663_v47 = vld [vmem:[#allocation6] sm:$0xf] }
 0x27a   : > { %v3870_v6 = vrot.slane %v3869_v17, 4  ;;  %v3732_v39 = vmul.f32 %v4956_v19, %v4956_v19  ;;  %vm3876_vm6 = vcmask 1040384   ;;  %vm3878_vm7 = vcmask 1041408   ;;  %s5469_s28 = smov [#allocation6]  }
 0x27b   : > { %v3694_v5 = vadd.f32 %v4956_v19, %v3693_v43  ;;  %v3762_v55 = vadd.f32 %v3761_v56, %v3731_v8  ;;  %v3803_v7 = vrot.slane %v3802_v20, 2  ;;  %s3933_s15 = sshll.u32 %s5469_s28, 4  ;;  %s3934_s15 = int_to_ptr.vmem [resolvable:$true] %s3933_s15 }
 0x27c   : > { %v3871_v2 = vadd.f32 %v3870_v6, %v3869_v17  ;;  %s5394_s17 = scalar_lea.vmem %s3934_s15, 64  ;;  %p5401_p13 = scmp.lt.s32.totalorder %s3934_s15, %s3934_s15 }
 0x27d   : > { %v3695_v62 = vrot.slane %v3694_v5, 4  ;;  %v3763_v35 = vadd.f32 %v3762_v55, %v3732_v39  ;;  %v3804_v54 = vadd.f32 %v3803_v7, %v3802_v20  ;;  %p5395_p5 = scmp.ne.s32.totalorder %s3934_s15, %s5394_s17  ;;  %p5402_p0 = scmp.lt.s32.totalorder %s5394_s17, %s5394_s17 }
 0x27e   : > { %v3872_v10 = vrot.slane %v3871_v2, 2 }
 0x27f   : > { %v3696_v3 = vadd.f32 %v3695_v62, %v3694_v5  ;;  %v3764_v51 = vrot.slane %v3763_v35, 4  ;;  %v3805_v25 = vrot.slane %v3804_v54, 1  ;;  %p5396_p11 = pnand %p5395_p5, %p108_p2  ;;  %p5403_p1 = por %p5402_p0, %p5401_p13 }
 0x280   : > { %v3873_v59 = vadd.f32 %v3872_v10, %v3871_v2 }
 0x281   : > { %v3697_v23 = vrot.slane %v3696_v3, 2  ;;  %v3765_v33 = vadd.f32 %v3764_v51, %v3763_v35  ;;  %v3806_v24 = vadd.f32 %v3805_v25, %v3804_v54  ;;  %p5397_p12 = pneg %p5396_p11 }
 0x282   : > { %v3874_v21 = vrot.slane %v3873_v59, 1 }
 0x283   : > { %v3698_v63 = vadd.f32 %v3697_v23, %v3696_v3  ;;  %v3766_v53 = vrot.slane %v3765_v33, 2  ;;  %p5404_p3 = pnand %p5403_p1, %p5397_p12 }
 0x284   : > { %v3875_v26 = vadd.f32 %v3874_v21, %v3873_v59 }
 0x285   : > { %v3699_v44 = vrot.slane %v3698_v63, 1  ;;  %v3767_v32 = vadd.f32 %v3766_v53, %v3765_v33 }
 0x287   : > { %v3768_v16 = vrot.slane %v3767_v32, 1  ;;  %v3700_v37 = vadd.f32 %v3699_v44, %v3698_v63 }
 0x289   : > { %v3769_v42 = vadd.f32 %v3768_v16, %v3767_v32 }
 0x28b   : > { %v3877_v22 = vsel %vm3876_vm6, %v3700_v37, %v3769_v42 }
 0x28c   : > { %v3879_v60 = vsel %vm3878_vm7, %v3877_v22, %v3806_v24 }
 0x28d   : > { %v3881_v14 = vsel %vm1304_vm3, %v3879_v60, %v3875_v26 }
 0x28e   : > { %v3882_v15 = vadd.f32 %v3881_v14, %v3663_v47 }
 0x290   : > { %3883 = vst [vmem:[#allocation6] sm:$0xf] %v3882_v15 }
 0x291   : > { %5407 = shalt.err (!%p5404_p3)
}
 0x292   : > { %s5408_s13 = scalar_lea.hbm %s6854_s5, 64 }
 0x293   : > { %p5409_p4 = scmp.ne.s32.totalorder %s6854_s5, %s5408_s13  ;;  %p5414_p9 = scmp.lt.u32.totalorder %s5408_s13, %s6854_s5 }
 0x295   : > { %p5410_p7 = pnand %p5409_p4, %p108_p2 }
 0x297   : > { %p5411_p8 = pneg %p5410_p7 }
 0x299   : > { %p5416_p10 = pnand %p5414_p9, %p5411_p8 }
 0x29b   : > { %5419 = shalt.err (!%p5416_p10)
}
 0x29c   : > { %5186 = dma.vmem_to_hbm [thread:$0]  (%p108_p2), %s3934_s15, 64, %s6854_s5, [#allocation5]  }
 0x29d   : > { %5437 = dma.done.wait (%p108_p2), [#allocation5], 64  }
 0x29e   : > { %5439 = vsyncadd (%p108_p2), [#allocation5], 4294967232 }
 0x29f PF: > { %p5200_p5 = scmp.ge.s32.totalorder %s5462_s21, 2  ;;  %s3949_s9 = sand.u32 1, %s5450_s18  }
 0x2a0   : > { %s3950_s16 = scalar_lea.sflag [#allocation3], %s3949_s9 }
 0x2a1   : > { %p5192_p11 = pnand %p5200_p5, %p5546_p6 }
 0x2a3   : > { %5441 = dma.done.wait (!%p5192_p11), %s3950_s16, 4096  }
 0x2a4   : > { %5443 = vsyncadd (!%p5192_p11), %s3950_s16, 4294963200  ;;  %s3958_s7 = sand.u32 1, %s4034_s23  }
 0x2a5   : > { %s3959_s10 = scalar_lea.sflag [#allocation5], %s3958_s7 }
 0x2a6   : > { %5445 = dma.done.wait (!%p5192_p11), %s3959_s10, 4096  }
 0x2a7   : > { %5447 = vsyncadd (!%p5192_p11), %s3959_s10, 4294963200  ;;  %p19_p2 = scmp.ge.s32.totalorder %s5525_s24, 4   ;;  %s6954_s18 = smov %s5454_s19 }
 0x2a8   : > { %s6955_s19 = smov %s5458_s20  ;;  %s6956_s20 = smov %s5538_s27 }
 0x2a9   : > { %s6957_s21 = smov %s5525_s24  ;;  %21 = sbr.rel (!%p19_p2) target bundleno = 5 (0x5), region = 96 }
 0x2b0   :  { %3964 = vsyncpa [#allocation3], 1 }
 0x2b1   :  { %3966 = vsyncpa [#allocation3 + $0x1], 1 }
 0x2b2   :  { %3967 = vsyncpa [#allocation5], 1 }
 0x2b3   :  { %3969 = vsyncpa [#allocation5 + $0x1], 1 }

</bundles_post_ra>
